<compile_context>
chip_gen: v6e
topology: v6e:2x2x1
jax: 0.10.0
libtpu: 0.0.40
codegen_flags: <defaults>
</compile_context>

<pallas_src>
import jax
import jax.numpy as jnp
from jax import lax
from jax.experimental import pallas as pl
from jax.experimental.pallas import tpu as pltpu
import numpy as np


# ----------------------------------------------------------------------------
# Kernel
# ----------------------------------------------------------------------------
def lstm_ias_kernel(emb_ref, lens_ref,
                    wih_ref, whh_ref, b_ref,
                    wslot_ref, bslot_ref, wint_ref, bint_ref,
                    slots_ref, intent_ref,
                    xproj_ref, hs_ref):
    """One batch-block: full LSTM recurrence + both heads.

    emb_ref   : (T, BB, E)   bf16  time-major embeddings (padded/aligned)
    lens_ref  : (BB, 1)      i32   sequence lengths
    wih_ref   : (E, 4H)      bf16  input->gates  (gate-block padded, i,f,g,o)
    whh_ref   : (H, 4H)      bf16  hidden->gates
    b_ref     : (1, 4H)      f32   b_ih + b_hh
    wslot_ref : (H, S) bf16, bslot_ref : (1, S) f32
    wint_ref  : (H, I) bf16, bint_ref  : (1, I) f32
    slots_ref : (T, BB, S)   f32   per-timestep slot logits
    intent_ref: (BB, I)      f32   intent logits from last valid hidden
    xproj_ref : (T, BB, 4H)  f32   VMEM scratch (precomputed input projection)
    hs_ref    : (T, BB, H)   bf16  VMEM scratch (masked hidden states)
    """
    T, BB, E = emb_ref.shape
    H = whh_ref.shape[0]
    S = slots_ref.shape[2]

    # Split the batch tile into two independent sub-tiles (when it divides
    # cleanly into 8-row sublane groups) so the MXU push of one sub-tile can
    # overlap the EUP/VPU gate math of the other.
    n_sub = 2 if (BB >= 16 and BB % 16 == 0) else 1
    SB = BB // n_sub

    # ---- hoisted input projection: one big lane-dense MXU matmul ----------
    x = emb_ref[...].reshape(T * BB, E)                          # bf16
    xp = (jnp.dot(x, wih_ref[...], preferred_element_type=jnp.float32)
          + b_ref[...])                                          # (T*BB, 4H) f32
    xproj_ref[...] = xp.reshape(T, BB, 4 * H)

    # ---- hoisted loop-invariant loads --------------------------------------
    whh = whh_ref[...]                                           # (H, 4H) bf16
    lens = lens_ref[...]                                         # (BB, 1) i32
    lens_sub = [lens[s * SB:(s + 1) * SB] for s in range(n_sub)]

    h0 = tuple(jnp.zeros((SB, H), jnp.float32) for _ in range(n_sub))
    c0 = tuple(jnp.zeros((SB, H), jnp.float32) for _ in range(n_sub))

    def body(t, carry):
        hs, cs = carry                                           # tuples of (SB, H) f32
        xp_t = xproj_ref[t]                                      # (BB, 4H) f32

        # Issue both (independent) recurrence matmuls up-front.
        gates = [xp_t[s * SB:(s + 1) * SB, :]
                 + jnp.dot(hs[s].astype(whh.dtype), whh,
                           preferred_element_type=jnp.float32)
                 for s in range(n_sub)]

        new_h, new_c = [], []
        for s in range(n_sub):
            g = gates[s]
            # PyTorch LSTM gate order: i, f, g, o (each a full 128-lane block)
            i_g = jax.nn.sigmoid(g[:, 0:H])
            f_g = jax.nn.sigmoid(g[:, H:2 * H])
            g_g = jnp.tanh(g[:, 2 * H:3 * H])
            o_g = jax.nn.sigmoid(g[:, 3 * H:4 * H])

            c_new = f_g * cs[s] + i_g * g_g
            h_new = o_g * jnp.tanh(c_new)

            # One broadcast per (step, sub-tile), reused by all three selects.
            valid = jnp.broadcast_to(t < lens_sub[s], (SB, H))
            new_h.append(jnp.where(valid, h_new, hs[s]))         # freeze past end
            new_c.append(jnp.where(valid, c_new, cs[s]))
            # pad_packed_sequence zero-pads the encoder output at padded steps.
            hs_ref[t, s * SB:(s + 1) * SB, :] = jnp.where(
                valid, h_new, 0.0).astype(hs_ref.dtype)
        return tuple(new_h), tuple(new_c)

    # Small fixed T: fully unroll so gate math of step t overlaps the MXU push
    # of step t+1.  h/c live in vregs for the whole recurrence.
    # TODO(synk): for long T, additionally tile/pipeline the T axis (grid axis
    # or pltpu.emit_pipeline) so xproj/hs/slots stay within VMEM (esp. v7x).
    h_fin, _ = lax.fori_loop(0, T, body, (h0, c0), unroll=True)

    # ---- hoisted slot head: one big matmul + one unmasked slab store -------
    hseq = hs_ref[...].reshape(T * BB, H)                        # bf16
    slots = (jnp.dot(hseq, wslot_ref[...], preferred_element_type=jnp.float32)
             + bslot_ref[...])
    slots_ref[...] = slots.reshape(T, BB, S)

    # last_hidden[-1] == h at each sequence's final valid timestep
    wint = wint_ref[...]
    bint = bint_ref[...]
    for s in range(n_sub):
        intent_ref[s * SB:(s + 1) * SB, :] = (
            jnp.dot(h_fin[s].astype(wint.dtype), wint,
                    preferred_element_type=jnp.float32) + bint)


# ----------------------------------------------------------------------------
# Glue / wrapper
# ----------------------------------------------------------------------------
def _round_up(x, m):
    return (x + m - 1) // m * m


def _pad_gates(w, H, H_pad):
    """Pad the 4H gate axis (PyTorch order i,f,g,o) block-wise to 4*H_pad."""
    lead = w.shape[0]
    w4 = w.reshape(lead, 4, H)
    w4 = jnp.pad(w4, ((0, 0), (0, 0), (0, H_pad - H)))
    return w4.reshape(lead, 4 * H_pad)


def model_ias_forward(utterance, seq_lengths, params,
                      compute_dtype=jnp.bfloat16):
    """utterance: (B, T) int32 token ids, seq_lengths: (B,) int32."""
    emb_table = params["embedding"]                  # (V, E), row 0 zeroed
    V, E = emb_table.shape
    H = params["w_hh"].shape[0]
    S = params["w_slot"].shape[1]
    I = params["w_int"].shape[1]
    B, T = utterance.shape

    # Hardware-aligned padded sizes (sublane=8, lane=128).
    E_pad = _round_up(E, 128)
    H_pad = _round_up(H, 128)
    S_pad = _round_up(S, 128)
    I_pad = _round_up(I, 128)

    # Batch tile: as large as the batch allows (fills the MXU M dimension,
    # 8x fewer W_hh pushes than BB=8, fewer fixed-overhead grid steps), capped
    # at 64 rows so the vreg-carried h/c state (+ transient gates) does not
    # spill.  When the batch is big enough, shrink BB so >= 2 grid blocks
    # exist and the "parallel" axis can shard across TensorCores (v7x).
    B8 = _round_up(B, 8)
    BB = min(64, B8)
    if B8 // BB < 2 and B8 >= 16:
        BB = _round_up(B8 // 2, 8)
    B_pad = _round_up(B8, BB)

    # ---- pad params to aligned tiles (zeros keep real entries exact) -------
    emb_p = jnp.pad(emb_table, ((0, 0), (0, E_pad - E))).astype(compute_dtype)
    w_ih = _pad_gates(jnp.pad(params["w_ih"], ((0, E_pad - E), (0, 0))),
                      H, H_pad).astype(compute_dtype)
    w_hh = _pad_gates(jnp.pad(params["w_hh"], ((0, H_pad - H), (0, 0))),
                      H, H_pad).astype(compute_dtype)
    b_g = _pad_gates(params["b_gates"], H, H_pad)                       # f32
    w_slot = jnp.pad(params["w_slot"],
                     ((0, H_pad - H), (0, S_pad - S))).astype(compute_dtype)
    b_slot = jnp.pad(params["b_slot"], ((0, 0), (0, S_pad - S)))        # f32
    w_int = jnp.pad(params["w_int"],
                    ((0, H_pad - H), (0, I_pad - I))).astype(compute_dtype)
    b_int = jnp.pad(params["b_int"], ((0, 0), (0, I_pad - I)))          # f32

    utt_p = jnp.pad(utterance, ((0, B_pad - B), (0, 0)))     # pad rows = token 0
    lens_p = jnp.pad(seq_lengths.astype(jnp.int32),
                     (0, B_pad - B)).reshape(B_pad, 1)       # pad rows -> len 0

    # Gather embeddings directly time-major: no (B,T,E) transpose in HLO.
    # TODO(synk): move this gather into the kernel (scalar-prefetch token ids
    # + pl.Element row-gather) to avoid the extra HBM round-trip for big B*T*E.
    emb_tbe = emb_p[utt_p.T]                                 # (T, B_pad, E_pad) bf16

    n_blocks = B_pad // BB
    const2 = lambda b: (0, 0)

    # NOTE: the constant-index weight/bias inputs never re-DMA; if VMEM gets
    # tight at large H, mark them pipeline_mode=pl.Buffered(1) to drop their
    # second buffer.
    grid_spec = pltpu.PrefetchScalarGridSpec(
        num_scalar_prefetch=0,
        grid=(n_blocks,),
        in_specs=[
            pl.BlockSpec((T, BB, E_pad), lambda b: (0, b, 0)),   # emb (time-major)
            pl.BlockSpec((BB, 1), lambda b: (b, 0)),             # lens
            pl.BlockSpec((E_pad, 4 * H_pad), const2),            # w_ih
            pl.BlockSpec((H_pad, 4 * H_pad), const2),            # w_hh
            pl.BlockSpec((1, 4 * H_pad), const2),                # b_gates
            pl.BlockSpec((H_pad, S_pad), const2),                # w_slot
            pl.BlockSpec((1, S_pad), const2),                    # b_slot
            pl.BlockSpec((H_pad, I_pad), const2),                # w_int
            pl.BlockSpec((1, I_pad), const2),                    # b_int
        ],
        out_specs=(
            pl.BlockSpec((T, BB, S_pad), lambda b: (0, b, 0)),   # slots (T,B,S)
            pl.BlockSpec((BB, I_pad), lambda b: (b, 0)),         # intent (B,I)
        ),
        scratch_shapes=[
            pltpu.VMEM((T, BB, 4 * H_pad), jnp.float32),         # xproj (f32)
            pltpu.VMEM((T, BB, H_pad), compute_dtype),           # masked hiddens (bf16)
        ],
    )

    slots_full, intent_full = pl.pallas_call(
        lstm_ias_kernel,
        out_shape=(jax.ShapeDtypeStruct((T, B_pad, S_pad), jnp.float32),
                   jax.ShapeDtypeStruct((B_pad, I_pad), jnp.float32)),
        grid_spec=grid_spec,
        compiler_params=pltpu.CompilerParams(
            dimension_semantics=("parallel",),       # batch blocks -> megacore/2 TCs
            # Raise the default scoped VMEM cap (16 MiB v5e / 32 MiB v6e+);
            # re-derive when scaling BB/T on v7x (64 MiB physical).
            vmem_limit_bytes=64 * 1024 * 1024),
    )(emb_tbe, lens_p, w_ih, w_hh, b_g, w_slot, b_slot, w_int, b_int)

    # Slice away padding, then apply the module's final permute(0, 2, 1).
    slots = jnp.transpose(slots_full[:, :B, :S], (1, 2, 0))   # (B, out_slot, T)
    intent = intent_full[:B, :I]                              # (B, out_int)
    return slots, intent


# ----------------------------------------------------------------------------
# Pure-JAX (f32) reference matching the PyTorch forward semantics
# ----------------------------------------------------------------------------
def ref_forward(utterance, seq_lengths, params):
    emb = params["embedding"][utterance]             # (B, T, E)
    B, T, _ = emb.shape
    H = params["w_hh"].shape[0]
    h = jnp.zeros((B, H), jnp.float32)
    c = jnp.zeros((B, H), jnp.float32)
    outs = []
    for t in range(T):
        x_t = emb[:, t, :]
        gates = x_t @ params["w_ih"] + h @ params["w_hh"] + params["b_gates"]
        i_g = jax.nn.sigmoid(gates[:, :H])
        f_g = jax.nn.sigmoid(gates[:, H:2 * H])
        g_g = jnp.tanh(gates[:, 2 * H:3 * H])
        o_g = jax.nn.sigmoid(gates[:, 3 * H:4 * H])
        c_new = f_g * c + i_g * g_g
        h_new = o_g * jnp.tanh(c_new)
        valid = (t < seq_lengths)[:, None]
        h = jnp.where(valid, h_new, h)
        c = jnp.where(valid, c_new, c)
        outs.append(jnp.where(valid, h_new, 0.0))
    utt_encoded = jnp.stack(outs, axis=1)                          # (B, T, H)
    slots = utt_encoded @ params["w_slot"] + params["b_slot"]      # (B, T, S)
    intent = h @ params["w_int"] + params["b_int"]                 # (B, I)
    return jnp.transpose(slots, (0, 2, 1)), intent


def make_params(key, vocab_len, emb_size, hid_size, out_slot, out_int, pad_index=0):
    ks = jax.random.split(key, 8)
    scale = 0.1
    embedding = scale * jax.random.normal(ks[0], (vocab_len, emb_size), jnp.float32)
    embedding = embedding.at[pad_index].set(0.0)       # nn.Embedding padding_idx
    w_ih = scale * jax.random.normal(ks[1], (emb_size, 4 * hid_size), jnp.float32)
    w_hh = scale * jax.random.normal(ks[2], (hid_size, 4 * hid_size), jnp.float32)
    b_gates = scale * jax.random.normal(ks[3], (1, 4 * hid_size), jnp.float32)  # b_ih+b_hh
    w_slot = scale * jax.random.normal(ks[4], (hid_size, out_slot), jnp.float32)
    b_slot = scale * jax.random.normal(ks[5], (1, out_slot), jnp.float32)
    w_int = scale * jax.random.normal(ks[6], (hid_size, out_int), jnp.float32)
    b_int = scale * jax.random.normal(ks[7], (1, out_int), jnp.float32)
    return dict(embedding=embedding, w_ih=w_ih, w_hh=w_hh, b_gates=b_gates,
                w_slot=w_slot, b_slot=b_slot, w_int=w_int, b_int=b_int)


if __name__ == "__main__":
    # Small shapes consistent with the module
    B, T = 2, 8
    vocab_len, emb_size, hid_size = 50, 32, 32
    out_slot, out_int = 16, 8
    pad_index = 0

    key = jax.random.PRNGKey(0)
    k_par, k_tok = jax.random.split(key)
    params = make_params(k_par, vocab_len, emb_size, hid_size, out_slot, out_int,
                         pad_index=pad_index)

    # Sorted-descending lengths (pack_padded_sequence enforce_sorted=True),
    # max length == T so the padded output width matches the input width.
    seq_lengths = jnp.array([8, 5], dtype=jnp.int32)
    utterance = jax.random.randint(k_tok, (B, T), 1, vocab_len, dtype=jnp.int32)
    tmask = jnp.arange(T)[None, :] < seq_lengths[:, None]
    utterance = jnp.where(tmask, utterance, pad_index)   # zero-pad past seq end

    slots, intent = model_ias_forward(utterance, seq_lengths, params)
    jax.block_until_ready((slots, intent))

    slots_ref, intent_ref = ref_forward(utterance, seq_lengths, params)
    assert slots.shape == (B, out_slot, T) and intent.shape == (B, out_int)
    # bf16 MXU inputs (f32 accumulation/state) -> loosened tolerance vs f32 ref.
    np.testing.assert_allclose(np.asarray(slots), np.asarray(slots_ref),
                               rtol=2e-2, atol=2e-2)
    np.testing.assert_allclose(np.asarray(intent), np.asarray(intent_ref),
                               rtol=2e-2, atol=2e-2)
    print("KERNEL_OK")
</pallas_src>

<mosaic_0001>
module attributes {stable_mosaic.version = 11 : i64} {
  func.func @lstm_ias_kernel(%arg0: i32, %arg1: memref<8x8x128xbf16, #tpu.memory_space<vmem>>, %arg2: memref<8x1xi32, #tpu.memory_space<vmem>>, %arg3: memref<128x512xbf16, #tpu.memory_space<vmem>>, %arg4: memref<128x512xbf16, #tpu.memory_space<vmem>>, %arg5: memref<1x512xf32, #tpu.memory_space<vmem>>, %arg6: memref<128x128xbf16, #tpu.memory_space<vmem>>, %arg7: memref<1x128xf32, #tpu.memory_space<vmem>>, %arg8: memref<128x128xbf16, #tpu.memory_space<vmem>>, %arg9: memref<1x128xf32, #tpu.memory_space<vmem>>, %arg10: memref<8x8x128xf32, #tpu.memory_space<vmem>>, %arg11: memref<8x128xf32, #tpu.memory_space<vmem>>, %arg12: memref<8x8x512xf32, #tpu.memory_space<vmem>>, %arg13: memref<8x8x128xbf16, #tpu.memory_space<vmem>>) attributes {dimension_semantics = [#tpu.dimension_semantics<parallel>], iteration_bounds = array<i64: 1>, scalar_prefetch = 0 : i64, scratch_operands = 2 : i64, tpu.core_type = #tpu.core_type<tc>, window_params = [{transform_indices = @transform_0, window_bounds = array<i64: 8, 8, 128>}, {transform_indices = @transform_1, window_bounds = array<i64: 8, 1>}, {pipeline_mode = #tpu.pipeline_mode<synchronous>, transform_indices = @transform_2, window_bounds = array<i64: 128, 512>}, {pipeline_mode = #tpu.pipeline_mode<synchronous>, transform_indices = @transform_3, window_bounds = array<i64: 128, 512>}, {pipeline_mode = #tpu.pipeline_mode<synchronous>, transform_indices = @transform_4, window_bounds = array<i64: 1, 512>}, {pipeline_mode = #tpu.pipeline_mode<synchronous>, transform_indices = @transform_5, window_bounds = array<i64: 128, 128>}, {pipeline_mode = #tpu.pipeline_mode<synchronous>, transform_indices = @transform_6, window_bounds = array<i64: 1, 128>}, {pipeline_mode = #tpu.pipeline_mode<synchronous>, transform_indices = @transform_7, window_bounds = array<i64: 128, 128>}, {pipeline_mode = #tpu.pipeline_mode<synchronous>, transform_indices = @transform_8, window_bounds = array<i64: 1, 128>}, {transform_indices = @transform_9, window_bounds = array<i64: 8, 8, 128>}, {transform_indices = @transform_10, window_bounds = array<i64: 8, 128>}]} {
    %c0 = arith.constant 0 : index
    %c0_0 = arith.constant 0 : index
    %c0_1 = arith.constant 0 : index
    %0 = vector.load %arg1[%c0, %c0_0, %c0_1] : memref<8x8x128xbf16, #tpu.memory_space<vmem>>, vector<8x8x128xbf16>
    %1 = vector.shape_cast %0 : vector<8x8x128xbf16> to vector<64x128xbf16>
    %c0_2 = arith.constant 0 : index
    %c0_3 = arith.constant 0 : index
    %2 = vector.load %arg3[%c0_2, %c0_3] : memref<128x512xbf16, #tpu.memory_space<vmem>>, vector<128x512xbf16>
    %cst = arith.constant dense<0.000000e+00> : vector<64x512xf32>
    %3 = tpu.matmul %1, %2, %cst {dimension_numbers = #tpu.dot_dimension_numbers<[1], [0], [0], [1], [0, 0, 1, 1], [], []>} : vector<64x128xbf16>, vector<128x512xbf16>, vector<64x512xf32> -> vector<64x512xf32>
    %c0_4 = arith.constant 0 : index
    %c0_5 = arith.constant 0 : index
    %4 = vector.load %arg5[%c0_4, %c0_5] : memref<1x512xf32, #tpu.memory_space<vmem>>, vector<1x512xf32>
    %5 = vector.broadcast %4 : vector<1x512xf32> to vector<64x512xf32>
    %6 = arith.addf %3, %5 : vector<64x512xf32>
    %7 = vector.shape_cast %6 : vector<64x512xf32> to vector<8x8x512xf32>
    %c0_6 = arith.constant 0 : index
    %c0_7 = arith.constant 0 : index
    %c0_8 = arith.constant 0 : index
    %8 = vector.load %arg12[%c0_6, %c0_7, %c0_8] : memref<8x8x512xf32, #tpu.memory_space<vmem>>, vector<8x8x512xf32>
    tpu.vector_store %arg12[%c0_6, %c0_7, %c0_8], %7 {strides = array<i32>} : memref<8x8x512xf32, #tpu.memory_space<vmem>>, vector<8x8x512xf32>,
    %c0_9 = arith.constant 0 : index
    %c0_10 = arith.constant 0 : index
    %9 = vector.load %arg4[%c0_9, %c0_10] : memref<128x512xbf16, #tpu.memory_space<vmem>>, vector<128x512xbf16>
    %c0_11 = arith.constant 0 : index
    %c0_12 = arith.constant 0 : index
    %10 = vector.load %arg2[%c0_11, %c0_12] : memref<8x1xi32, #tpu.memory_space<vmem>>, vector<8x1xi32>
    %cst_13 = arith.constant 0.000000e+00 : f32
    %11 = vector.broadcast %cst_13 : f32 to vector<8x128xf32>
    %cst_14 = arith.constant 0.000000e+00 : f32
    %12 = vector.broadcast %cst_14 : f32 to vector<8x128xf32>
    %c0_i32 = arith.constant 0 : i32
    %13 = arith.index_cast %c0_i32 : i32 to index
    %c0_15 = arith.constant 0 : index
    %c0_16 = arith.constant 0 : index
    %14 = vector.load %arg12[%13, %c0_15, %c0_16] : memref<8x8x512xf32, #tpu.memory_space<vmem>>, vector<1x8x512xf32>
    %15 = vector.shape_cast %14 : vector<1x8x512xf32> to vector<8x512xf32>
    %16 = arith.truncf %11 : vector<8x128xf32> to vector<8x128xbf16>
    %cst_17 = arith.constant dense<0.000000e+00> : vector<8x512xf32>
    %17 = tpu.matmul %16, %9, %cst_17 {dimension_numbers = #tpu.dot_dimension_numbers<[1], [0], [0], [1], [0, 0, 1, 1], [], []>} : vector<8x128xbf16>, vector<128x512xbf16>, vector<8x512xf32> -> vector<8x512xf32>
    %18 = arith.addf %15, %17 : vector<8x512xf32>
    %19 = vector.extract_strided_slice %18 {offsets = [0, 0], sizes = [8, 128], strides = [1, 1]} : vector<8x512xf32> to vector<8x128xf32>
    %20 = arith.negf %19 : vector<8x128xf32>
    %21 = math.exp %20 : vector<8x128xf32>
    %cst_18 = arith.constant 1.000000e+00 : f32
    %22 = vector.broadcast %cst_18 : f32 to vector<8x128xf32>
    %23 = arith.addf %22, %21 : vector<8x128xf32>
    %24 = arith.divf %22, %23 : vector<8x128xf32>
    %25 = vector.extract_strided_slice %18 {offsets = [0, 128], sizes = [8, 128], strides = [1, 1]} : vector<8x512xf32> to vector<8x128xf32>
    %26 = arith.negf %25 : vector<8x128xf32>
    %27 = math.exp %26 : vector<8x128xf32>
    %cst_19 = arith.constant 1.000000e+00 : f32
    %28 = vector.broadcast %cst_19 : f32 to vector<8x128xf32>
    %29 = arith.addf %28, %27 : vector<8x128xf32>
    %30 = arith.divf %28, %29 : vector<8x128xf32>
    %31 = vector.extract_strided_slice %18 {offsets = [0, 256], sizes = [8, 128], strides = [1, 1]} : vector<8x512xf32> to vector<8x128xf32>
    %32 = math.tanh %31 : vector<8x128xf32>
    %33 = vector.extract_strided_slice %18 {offsets = [0, 384], sizes = [8, 128], strides = [1, 1]} : vector<8x512xf32> to vector<8x128xf32>
    %34 = arith.negf %33 : vector<8x128xf32>
    %35 = math.exp %34 : vector<8x128xf32>
    %cst_20 = arith.constant 1.000000e+00 : f32
    %36 = vector.broadcast %cst_20 : f32 to vector<8x128xf32>
    %37 = arith.addf %36, %35 : vector<8x128xf32>
    %38 = arith.divf %36, %37 : vector<8x128xf32>
    %39 = arith.mulf %30, %12 : vector<8x128xf32>
    %40 = arith.mulf %24, %32 : vector<8x128xf32>
    %41 = arith.addf %39, %40 : vector<8x128xf32>
    %42 = math.tanh %41 : vector<8x128xf32>
    %43 = arith.mulf %38, %42 : vector<8x128xf32>
    %44 = vector.broadcast %c0_i32 : i32 to vector<8x1xi32>
    %45 = arith.cmpi slt, %44, %10 : vector<8x1xi32>
    %46 = vector.shape_cast %45 : vector<8x1xi1> to vector<8x1xi1>
    %47 = vector.broadcast %46 : vector<8x1xi1> to vector<8x128xi1>
    %48 = arith.select %47, %43, %11 : vector<8x128xi1>, vector<8x128xf32>
    %49 = arith.select %47, %41, %12 : vector<8x128xi1>, vector<8x128xf32>
    %cst_21 = arith.constant 0.000000e+00 : f32
    %50 = vector.broadcast %cst_21 : f32 to vector<8x128xf32>
    %51 = arith.select %47, %43, %50 : vector<8x128xi1>, vector<8x128xf32>
    %52 = arith.truncf %51 : vector<8x128xf32> to vector<8x128xbf16>
    %53 = arith.index_cast %c0_i32 : i32 to index
    %c0_22 = arith.constant 0 : index
    %c0_23 = arith.constant 0 : index
    %54 = vector.load %arg13[%53, %c0_22, %c0_23] : memref<8x8x128xbf16, #tpu.memory_space<vmem>>, vector<1x8x128xbf16>
    %55 = vector.shape_cast %54 : vector<1x8x128xbf16> to vector<8x128xbf16>
    %56 = vector.shape_cast %52 : vector<8x128xbf16> to vector<1x8x128xbf16>
    tpu.vector_store %arg13[%53, %c0_22, %c0_23], %56 {strides = array<i32>} : memref<8x8x128xbf16, #tpu.memory_space<vmem>>, vector<1x8x128xbf16>,
    %c1_i32 = arith.constant 1 : i32
    %57 = arith.index_cast %c1_i32 : i32 to index
    %c0_24 = arith.constant 0 : index
    %c0_25 = arith.constant 0 : index
    %58 = vector.load %arg12[%57, %c0_24, %c0_25] : memref<8x8x512xf32, #tpu.memory_space<vmem>>, vector<1x8x512xf32>
    %59 = vector.shape_cast %58 : vector<1x8x512xf32> to vector<8x512xf32>
    %60 = arith.truncf %48 : vector<8x128xf32> to vector<8x128xbf16>
    %cst_26 = arith.constant dense<0.000000e+00> : vector<8x512xf32>
    %61 = tpu.matmul %60, %9, %cst_26 {dimension_numbers = #tpu.dot_dimension_numbers<[1], [0], [0], [1], [0, 0, 1, 1], [], []>} : vector<8x128xbf16>, vector<128x512xbf16>, vector<8x512xf32> -> vector<8x512xf32>
    %62 = arith.addf %59, %61 : vector<8x512xf32>
    %63 = vector.extract_strided_slice %62 {offsets = [0, 0], sizes = [8, 128], strides = [1, 1]} : vector<8x512xf32> to vector<8x128xf32>
    %64 = arith.negf %63 : vector<8x128xf32>
    %65 = math.exp %64 : vector<8x128xf32>
    %cst_27 = arith.constant 1.000000e+00 : f32
    %66 = vector.broadcast %cst_27 : f32 to vector<8x128xf32>
    %67 = arith.addf %66, %65 : vector<8x128xf32>
    %68 = arith.divf %66, %67 : vector<8x128xf32>
    %69 = vector.extract_strided_slice %62 {offsets = [0, 128], sizes = [8, 128], strides = [1, 1]} : vector<8x512xf32> to vector<8x128xf32>
    %70 = arith.negf %69 : vector<8x128xf32>
    %71 = math.exp %70 : vector<8x128xf32>
    %cst_28 = arith.constant 1.000000e+00 : f32
    %72 = vector.broadcast %cst_28 : f32 to vector<8x128xf32>
    %73 = arith.addf %72, %71 : vector<8x128xf32>
    %74 = arith.divf %72, %73 : vector<8x128xf32>
    %75 = vector.extract_strided_slice %62 {offsets = [0, 256], sizes = [8, 128], strides = [1, 1]} : vector<8x512xf32> to vector<8x128xf32>
    %76 = math.tanh %75 : vector<8x128xf32>
    %77 = vector.extract_strided_slice %62 {offsets = [0, 384], sizes = [8, 128], strides = [1, 1]} : vector<8x512xf32> to vector<8x128xf32>
    %78 = arith.negf %77 : vector<8x128xf32>
    %79 = math.exp %78 : vector<8x128xf32>
    %cst_29 = arith.constant 1.000000e+00 : f32
    %80 = vector.broadcast %cst_29 : f32 to vector<8x128xf32>
    %81 = arith.addf %80, %79 : vector<8x128xf32>
    %82 = arith.divf %80, %81 : vector<8x128xf32>
    %83 = arith.mulf %74, %49 : vector<8x128xf32>
    %84 = arith.mulf %68, %76 : vector<8x128xf32>
    %85 = arith.addf %83, %84 : vector<8x128xf32>
    %86 = math.tanh %85 : vector<8x128xf32>
    %87 = arith.mulf %82, %86 : vector<8x128xf32>
    %88 = vector.broadcast %c1_i32 : i32 to vector<8x1xi32>
    %89 = arith.cmpi slt, %88, %10 : vector<8x1xi32>
    %90 = vector.shape_cast %89 : vector<8x1xi1> to vector<8x1xi1>
    %91 = vector.broadcast %90 : vector<8x1xi1> to vector<8x128xi1>
    %92 = arith.select %91, %87, %48 : vector<8x128xi1>, vector<8x128xf32>
    %93 = arith.select %91, %85, %49 : vector<8x128xi1>, vector<8x128xf32>
    %cst_30 = arith.constant 0.000000e+00 : f32
    %94 = vector.broadcast %cst_30 : f32 to vector<8x128xf32>
    %95 = arith.select %91, %87, %94 : vector<8x128xi1>, vector<8x128xf32>
    %96 = arith.truncf %95 : vector<8x128xf32> to vector<8x128xbf16>
    %97 = arith.index_cast %c1_i32 : i32 to index
    %c0_31 = arith.constant 0 : index
    %c0_32 = arith.constant 0 : index
    %98 = vector.load %arg13[%97, %c0_31, %c0_32] : memref<8x8x128xbf16, #tpu.memory_space<vmem>>, vector<1x8x128xbf16>
    %99 = vector.shape_cast %98 : vector<1x8x128xbf16> to vector<8x128xbf16>
    %100 = vector.shape_cast %96 : vector<8x128xbf16> to vector<1x8x128xbf16>
    tpu.vector_store %arg13[%97, %c0_31, %c0_32], %100 {strides = array<i32>} : memref<8x8x128xbf16, #tpu.memory_space<vmem>>, vector<1x8x128xbf16>,
    %c2_i32 = arith.constant 2 : i32
    %101 = arith.index_cast %c2_i32 : i32 to index
    %c0_33 = arith.constant 0 : index
    %c0_34 = arith.constant 0 : index
    %102 = vector.load %arg12[%101, %c0_33, %c0_34] : memref<8x8x512xf32, #tpu.memory_space<vmem>>, vector<1x8x512xf32>
    %103 = vector.shape_cast %102 : vector<1x8x512xf32> to vector<8x512xf32>
    %104 = arith.truncf %92 : vector<8x128xf32> to vector<8x128xbf16>
    %cst_35 = arith.constant dense<0.000000e+00> : vector<8x512xf32>
    %105 = tpu.matmul %104, %9, %cst_35 {dimension_numbers = #tpu.dot_dimension_numbers<[1], [0], [0], [1], [0, 0, 1, 1], [], []>} : vector<8x128xbf16>, vector<128x512xbf16>, vector<8x512xf32> -> vector<8x512xf32>
    %106 = arith.addf %103, %105 : vector<8x512xf32>
    %107 = vector.extract_strided_slice %106 {offsets = [0, 0], sizes = [8, 128], strides = [1, 1]} : vector<8x512xf32> to vector<8x128xf32>
    %108 = arith.negf %107 : vector<8x128xf32>
    %109 = math.exp %108 : vector<8x128xf32>
    %cst_36 = arith.constant 1.000000e+00 : f32
    %110 = vector.broadcast %cst_36 : f32 to vector<8x128xf32>
    %111 = arith.addf %110, %109 : vector<8x128xf32>
    %112 = arith.divf %110, %111 : vector<8x128xf32>
    %113 = vector.extract_strided_slice %106 {offsets = [0, 128], sizes = [8, 128], strides = [1, 1]} : vector<8x512xf32> to vector<8x128xf32>
    %114 = arith.negf %113 : vector<8x128xf32>
    %115 = math.exp %114 : vector<8x128xf32>
    %cst_37 = arith.constant 1.000000e+00 : f32
    %116 = vector.broadcast %cst_37 : f32 to vector<8x128xf32>
    %117 = arith.addf %116, %115 : vector<8x128xf32>
    %118 = arith.divf %116, %117 : vector<8x128xf32>
    %119 = vector.extract_strided_slice %106 {offsets = [0, 256], sizes = [8, 128], strides = [1, 1]} : vector<8x512xf32> to vector<8x128xf32>
    %120 = math.tanh %119 : vector<8x128xf32>
    %121 = vector.extract_strided_slice %106 {offsets = [0, 384], sizes = [8, 128], strides = [1, 1]} : vector<8x512xf32> to vector<8x128xf32>
    %122 = arith.negf %121 : vector<8x128xf32>
    %123 = math.exp %122 : vector<8x128xf32>
    %cst_38 = arith.constant 1.000000e+00 : f32
    %124 = vector.broadcast %cst_38 : f32 to vector<8x128xf32>
    %125 = arith.addf %124, %123 : vector<8x128xf32>
    %126 = arith.divf %124, %125 : vector<8x128xf32>
    %127 = arith.mulf %118, %93 : vector<8x128xf32>
    %128 = arith.mulf %112, %120 : vector<8x128xf32>
    %129 = arith.addf %127, %128 : vector<8x128xf32>
    %130 = math.tanh %129 : vector<8x128xf32>
    %131 = arith.mulf %126, %130 : vector<8x128xf32>
    %132 = vector.broadcast %c2_i32 : i32 to vector<8x1xi32>
    %133 = arith.cmpi slt, %132, %10 : vector<8x1xi32>
    %134 = vector.shape_cast %133 : vector<8x1xi1> to vector<8x1xi1>
    %135 = vector.broadcast %134 : vector<8x1xi1> to vector<8x128xi1>
    %136 = arith.select %135, %131, %92 : vector<8x128xi1>, vector<8x128xf32>
    %137 = arith.select %135, %129, %93 : vector<8x128xi1>, vector<8x128xf32>
    %cst_39 = arith.constant 0.000000e+00 : f32
    %138 = vector.broadcast %cst_39 : f32 to vector<8x128xf32>
    %139 = arith.select %135, %131, %138 : vector<8x128xi1>, vector<8x128xf32>
    %140 = arith.truncf %139 : vector<8x128xf32> to vector<8x128xbf16>
    %141 = arith.index_cast %c2_i32 : i32 to index
    %c0_40 = arith.constant 0 : index
    %c0_41 = arith.constant 0 : index
    %142 = vector.load %arg13[%141, %c0_40, %c0_41] : memref<8x8x128xbf16, #tpu.memory_space<vmem>>, vector<1x8x128xbf16>
    %143 = vector.shape_cast %142 : vector<1x8x128xbf16> to vector<8x128xbf16>
    %144 = vector.shape_cast %140 : vector<8x128xbf16> to vector<1x8x128xbf16>
    tpu.vector_store %arg13[%141, %c0_40, %c0_41], %144 {strides = array<i32>} : memref<8x8x128xbf16, #tpu.memory_space<vmem>>, vector<1x8x128xbf16>,
    %c3_i32 = arith.constant 3 : i32
    %145 = arith.index_cast %c3_i32 : i32 to index
    %c0_42 = arith.constant 0 : index
    %c0_43 = arith.constant 0 : index
    %146 = vector.load %arg12[%145, %c0_42, %c0_43] : memref<8x8x512xf32, #tpu.memory_space<vmem>>, vector<1x8x512xf32>
    %147 = vector.shape_cast %146 : vector<1x8x512xf32> to vector<8x512xf32>
    %148 = arith.truncf %136 : vector<8x128xf32> to vector<8x128xbf16>
    %cst_44 = arith.constant dense<0.000000e+00> : vector<8x512xf32>
    %149 = tpu.matmul %148, %9, %cst_44 {dimension_numbers = #tpu.dot_dimension_numbers<[1], [0], [0], [1], [0, 0, 1, 1], [], []>} : vector<8x128xbf16>, vector<128x512xbf16>, vector<8x512xf32> -> vector<8x512xf32>
    %150 = arith.addf %147, %149 : vector<8x512xf32>
    %151 = vector.extract_strided_slice %150 {offsets = [0, 0], sizes = [8, 128], strides = [1, 1]} : vector<8x512xf32> to vector<8x128xf32>
    %152 = arith.negf %151 : vector<8x128xf32>
    %153 = math.exp %152 : vector<8x128xf32>
    %cst_45 = arith.constant 1.000000e+00 : f32
    %154 = vector.broadcast %cst_45 : f32 to vector<8x128xf32>
    %155 = arith.addf %154, %153 : vector<8x128xf32>
    %156 = arith.divf %154, %155 : vector<8x128xf32>
    %157 = vector.extract_strided_slice %150 {offsets = [0, 128], sizes = [8, 128], strides = [1, 1]} : vector<8x512xf32> to vector<8x128xf32>
    %158 = arith.negf %157 : vector<8x128xf32>
    %159 = math.exp %158 : vector<8x128xf32>
    %cst_46 = arith.constant 1.000000e+00 : f32
    %160 = vector.broadcast %cst_46 : f32 to vector<8x128xf32>
    %161 = arith.addf %160, %159 : vector<8x128xf32>
    %162 = arith.divf %160, %161 : vector<8x128xf32>
    %163 = vector.extract_strided_slice %150 {offsets = [0, 256], sizes = [8, 128], strides = [1, 1]} : vector<8x512xf32> to vector<8x128xf32>
    %164 = math.tanh %163 : vector<8x128xf32>
    %165 = vector.extract_strided_slice %150 {offsets = [0, 384], sizes = [8, 128], strides = [1, 1]} : vector<8x512xf32> to vector<8x128xf32>
    %166 = arith.negf %165 : vector<8x128xf32>
    %167 = math.exp %166 : vector<8x128xf32>
    %cst_47 = arith.constant 1.000000e+00 : f32
    %168 = vector.broadcast %cst_47 : f32 to vector<8x128xf32>
    %169 = arith.addf %168, %167 : vector<8x128xf32>
    %170 = arith.divf %168, %169 : vector<8x128xf32>
    %171 = arith.mulf %162, %137 : vector<8x128xf32>
    %172 = arith.mulf %156, %164 : vector<8x128xf32>
    %173 = arith.addf %171, %172 : vector<8x128xf32>
    %174 = math.tanh %173 : vector<8x128xf32>
    %175 = arith.mulf %170, %174 : vector<8x128xf32>
    %176 = vector.broadcast %c3_i32 : i32 to vector<8x1xi32>
    %177 = arith.cmpi slt, %176, %10 : vector<8x1xi32>
    %178 = vector.shape_cast %177 : vector<8x1xi1> to vector<8x1xi1>
    %179 = vector.broadcast %178 : vector<8x1xi1> to vector<8x128xi1>
    %180 = arith.select %179, %175, %136 : vector<8x128xi1>, vector<8x128xf32>
    %181 = arith.select %179, %173, %137 : vector<8x128xi1>, vector<8x128xf32>
    %cst_48 = arith.constant 0.000000e+00 : f32
    %182 = vector.broadcast %cst_48 : f32 to vector<8x128xf32>
    %183 = arith.select %179, %175, %182 : vector<8x128xi1>, vector<8x128xf32>
    %184 = arith.truncf %183 : vector<8x128xf32> to vector<8x128xbf16>
    %185 = arith.index_cast %c3_i32 : i32 to index
    %c0_49 = arith.constant 0 : index
    %c0_50 = arith.constant 0 : index
    %186 = vector.load %arg13[%185, %c0_49, %c0_50] : memref<8x8x128xbf16, #tpu.memory_space<vmem>>, vector<1x8x128xbf16>
    %187 = vector.shape_cast %186 : vector<1x8x128xbf16> to vector<8x128xbf16>
    %188 = vector.shape_cast %184 : vector<8x128xbf16> to vector<1x8x128xbf16>
    tpu.vector_store %arg13[%185, %c0_49, %c0_50], %188 {strides = array<i32>} : memref<8x8x128xbf16, #tpu.memory_space<vmem>>, vector<1x8x128xbf16>,
    %c4_i32 = arith.constant 4 : i32
    %189 = arith.index_cast %c4_i32 : i32 to index
    %c0_51 = arith.constant 0 : index
    %c0_52 = arith.constant 0 : index
    %190 = vector.load %arg12[%189, %c0_51, %c0_52] : memref<8x8x512xf32, #tpu.memory_space<vmem>>, vector<1x8x512xf32>
    %191 = vector.shape_cast %190 : vector<1x8x512xf32> to vector<8x512xf32>
    %192 = arith.truncf %180 : vector<8x128xf32> to vector<8x128xbf16>
    %cst_53 = arith.constant dense<0.000000e+00> : vector<8x512xf32>
    %193 = tpu.matmul %192, %9, %cst_53 {dimension_numbers = #tpu.dot_dimension_numbers<[1], [0], [0], [1], [0, 0, 1, 1], [], []>} : vector<8x128xbf16>, vector<128x512xbf16>, vector<8x512xf32> -> vector<8x512xf32>
    %194 = arith.addf %191, %193 : vector<8x512xf32>
    %195 = vector.extract_strided_slice %194 {offsets = [0, 0], sizes = [8, 128], strides = [1, 1]} : vector<8x512xf32> to vector<8x128xf32>
    %196 = arith.negf %195 : vector<8x128xf32>
    %197 = math.exp %196 : vector<8x128xf32>
    %cst_54 = arith.constant 1.000000e+00 : f32
    %198 = vector.broadcast %cst_54 : f32 to vector<8x128xf32>
    %199 = arith.addf %198, %197 : vector<8x128xf32>
    %200 = arith.divf %198, %199 : vector<8x128xf32>
    %201 = vector.extract_strided_slice %194 {offsets = [0, 128], sizes = [8, 128], strides = [1, 1]} : vector<8x512xf32> to vector<8x128xf32>
    %202 = arith.negf %201 : vector<8x128xf32>
    %203 = math.exp %202 : vector<8x128xf32>
    %cst_55 = arith.constant 1.000000e+00 : f32
    %204 = vector.broadcast %cst_55 : f32 to vector<8x128xf32>
    %205 = arith.addf %204, %203 : vector<8x128xf32>
    %206 = arith.divf %204, %205 : vector<8x128xf32>
    %207 = vector.extract_strided_slice %194 {offsets = [0, 256], sizes = [8, 128], strides = [1, 1]} : vector<8x512xf32> to vector<8x128xf32>
    %208 = math.tanh %207 : vector<8x128xf32>
    %209 = vector.extract_strided_slice %194 {offsets = [0, 384], sizes = [8, 128], strides = [1, 1]} : vector<8x512xf32> to vector<8x128xf32>
    %210 = arith.negf %209 : vector<8x128xf32>
    %211 = math.exp %210 : vector<8x128xf32>
    %cst_56 = arith.constant 1.000000e+00 : f32
    %212 = vector.broadcast %cst_56 : f32 to vector<8x128xf32>
    %213 = arith.addf %212, %211 : vector<8x128xf32>
    %214 = arith.divf %212, %213 : vector<8x128xf32>
    %215 = arith.mulf %206, %181 : vector<8x128xf32>
    %216 = arith.mulf %200, %208 : vector<8x128xf32>
    %217 = arith.addf %215, %216 : vector<8x128xf32>
    %218 = math.tanh %217 : vector<8x128xf32>
    %219 = arith.mulf %214, %218 : vector<8x128xf32>
    %220 = vector.broadcast %c4_i32 : i32 to vector<8x1xi32>
    %221 = arith.cmpi slt, %220, %10 : vector<8x1xi32>
    %222 = vector.shape_cast %221 : vector<8x1xi1> to vector<8x1xi1>
    %223 = vector.broadcast %222 : vector<8x1xi1> to vector<8x128xi1>
    %224 = arith.select %223, %219, %180 : vector<8x128xi1>, vector<8x128xf32>
    %225 = arith.select %223, %217, %181 : vector<8x128xi1>, vector<8x128xf32>
    %cst_57 = arith.constant 0.000000e+00 : f32
    %226 = vector.broadcast %cst_57 : f32 to vector<8x128xf32>
    %227 = arith.select %223, %219, %226 : vector<8x128xi1>, vector<8x128xf32>
    %228 = arith.truncf %227 : vector<8x128xf32> to vector<8x128xbf16>
    %229 = arith.index_cast %c4_i32 : i32 to index
    %c0_58 = arith.constant 0 : index
    %c0_59 = arith.constant 0 : index
    %230 = vector.load %arg13[%229, %c0_58, %c0_59] : memref<8x8x128xbf16, #tpu.memory_space<vmem>>, vector<1x8x128xbf16>
    %231 = vector.shape_cast %230 : vector<1x8x128xbf16> to vector<8x128xbf16>
    %232 = vector.shape_cast %228 : vector<8x128xbf16> to vector<1x8x128xbf16>
    tpu.vector_store %arg13[%229, %c0_58, %c0_59], %232 {strides = array<i32>} : memref<8x8x128xbf16, #tpu.memory_space<vmem>>, vector<1x8x128xbf16>,
    %c5_i32 = arith.constant 5 : i32
    %233 = arith.index_cast %c5_i32 : i32 to index
    %c0_60 = arith.constant 0 : index
    %c0_61 = arith.constant 0 : index
    %234 = vector.load %arg12[%233, %c0_60, %c0_61] : memref<8x8x512xf32, #tpu.memory_space<vmem>>, vector<1x8x512xf32>
    %235 = vector.shape_cast %234 : vector<1x8x512xf32> to vector<8x512xf32>
    %236 = arith.truncf %224 : vector<8x128xf32> to vector<8x128xbf16>
    %cst_62 = arith.constant dense<0.000000e+00> : vector<8x512xf32>
    %237 = tpu.matmul %236, %9, %cst_62 {dimension_numbers = #tpu.dot_dimension_numbers<[1], [0], [0], [1], [0, 0, 1, 1], [], []>} : vector<8x128xbf16>, vector<128x512xbf16>, vector<8x512xf32> -> vector<8x512xf32>
    %238 = arith.addf %235, %237 : vector<8x512xf32>
    %239 = vector.extract_strided_slice %238 {offsets = [0, 0], sizes = [8, 128], strides = [1, 1]} : vector<8x512xf32> to vector<8x128xf32>
    %240 = arith.negf %239 : vector<8x128xf32>
    %241 = math.exp %240 : vector<8x128xf32>
    %cst_63 = arith.constant 1.000000e+00 : f32
    %242 = vector.broadcast %cst_63 : f32 to vector<8x128xf32>
    %243 = arith.addf %242, %241 : vector<8x128xf32>
    %244 = arith.divf %242, %243 : vector<8x128xf32>
    %245 = vector.extract_strided_slice %238 {offsets = [0, 128], sizes = [8, 128], strides = [1, 1]} : vector<8x512xf32> to vector<8x128xf32>
    %246 = arith.negf %245 : vector<8x128xf32>
    %247 = math.exp %246 : vector<8x128xf32>
    %cst_64 = arith.constant 1.000000e+00 : f32
    %248 = vector.broadcast %cst_64 : f32 to vector<8x128xf32>
    %249 = arith.addf %248, %247 : vector<8x128xf32>
    %250 = arith.divf %248, %249 : vector<8x128xf32>
    %251 = vector.extract_strided_slice %238 {offsets = [0, 256], sizes = [8, 128], strides = [1, 1]} : vector<8x512xf32> to vector<8x128xf32>
    %252 = math.tanh %251 : vector<8x128xf32>
    %253 = vector.extract_strided_slice %238 {offsets = [0, 384], sizes = [8, 128], strides = [1, 1]} : vector<8x512xf32> to vector<8x128xf32>
    %254 = arith.negf %253 : vector<8x128xf32>
    %255 = math.exp %254 : vector<8x128xf32>
    %cst_65 = arith.constant 1.000000e+00 : f32
    %256 = vector.broadcast %cst_65 : f32 to vector<8x128xf32>
    %257 = arith.addf %256, %255 : vector<8x128xf32>
    %258 = arith.divf %256, %257 : vector<8x128xf32>
    %259 = arith.mulf %250, %225 : vector<8x128xf32>
    %260 = arith.mulf %244, %252 : vector<8x128xf32>
    %261 = arith.addf %259, %260 : vector<8x128xf32>
    %262 = math.tanh %261 : vector<8x128xf32>
    %263 = arith.mulf %258, %262 : vector<8x128xf32>
    %264 = vector.broadcast %c5_i32 : i32 to vector<8x1xi32>
    %265 = arith.cmpi slt, %264, %10 : vector<8x1xi32>
    %266 = vector.shape_cast %265 : vector<8x1xi1> to vector<8x1xi1>
    %267 = vector.broadcast %266 : vector<8x1xi1> to vector<8x128xi1>
    %268 = arith.select %267, %263, %224 : vector<8x128xi1>, vector<8x128xf32>
    %269 = arith.select %267, %261, %225 : vector<8x128xi1>, vector<8x128xf32>
    %cst_66 = arith.constant 0.000000e+00 : f32
    %270 = vector.broadcast %cst_66 : f32 to vector<8x128xf32>
    %271 = arith.select %267, %263, %270 : vector<8x128xi1>, vector<8x128xf32>
    %272 = arith.truncf %271 : vector<8x128xf32> to vector<8x128xbf16>
    %273 = arith.index_cast %c5_i32 : i32 to index
    %c0_67 = arith.constant 0 : index
    %c0_68 = arith.constant 0 : index
    %274 = vector.load %arg13[%273, %c0_67, %c0_68] : memref<8x8x128xbf16, #tpu.memory_space<vmem>>, vector<1x8x128xbf16>
    %275 = vector.shape_cast %274 : vector<1x8x128xbf16> to vector<8x128xbf16>
    %276 = vector.shape_cast %272 : vector<8x128xbf16> to vector<1x8x128xbf16>
    tpu.vector_store %arg13[%273, %c0_67, %c0_68], %276 {strides = array<i32>} : memref<8x8x128xbf16, #tpu.memory_space<vmem>>, vector<1x8x128xbf16>,
    %c6_i32 = arith.constant 6 : i32
    %277 = arith.index_cast %c6_i32 : i32 to index
    %c0_69 = arith.constant 0 : index
    %c0_70 = arith.constant 0 : index
    %278 = vector.load %arg12[%277, %c0_69, %c0_70] : memref<8x8x512xf32, #tpu.memory_space<vmem>>, vector<1x8x512xf32>
    %279 = vector.shape_cast %278 : vector<1x8x512xf32> to vector<8x512xf32>
    %280 = arith.truncf %268 : vector<8x128xf32> to vector<8x128xbf16>
    %cst_71 = arith.constant dense<0.000000e+00> : vector<8x512xf32>
    %281 = tpu.matmul %280, %9, %cst_71 {dimension_numbers = #tpu.dot_dimension_numbers<[1], [0], [0], [1], [0, 0, 1, 1], [], []>} : vector<8x128xbf16>, vector<128x512xbf16>, vector<8x512xf32> -> vector<8x512xf32>
    %282 = arith.addf %279, %281 : vector<8x512xf32>
    %283 = vector.extract_strided_slice %282 {offsets = [0, 0], sizes = [8, 128], strides = [1, 1]} : vector<8x512xf32> to vector<8x128xf32>
    %284 = arith.negf %283 : vector<8x128xf32>
    %285 = math.exp %284 : vector<8x128xf32>
    %cst_72 = arith.constant 1.000000e+00 : f32
    %286 = vector.broadcast %cst_72 : f32 to vector<8x128xf32>
    %287 = arith.addf %286, %285 : vector<8x128xf32>
    %288 = arith.divf %286, %287 : vector<8x128xf32>
    %289 = vector.extract_strided_slice %282 {offsets = [0, 128], sizes = [8, 128], strides = [1, 1]} : vector<8x512xf32> to vector<8x128xf32>
    %290 = arith.negf %289 : vector<8x128xf32>
    %291 = math.exp %290 : vector<8x128xf32>
    %cst_73 = arith.constant 1.000000e+00 : f32
    %292 = vector.broadcast %cst_73 : f32 to vector<8x128xf32>
    %293 = arith.addf %292, %291 : vector<8x128xf32>
    %294 = arith.divf %292, %293 : vector<8x128xf32>
    %295 = vector.extract_strided_slice %282 {offsets = [0, 256], sizes = [8, 128], strides = [1, 1]} : vector<8x512xf32> to vector<8x128xf32>
    %296 = math.tanh %295 : vector<8x128xf32>
    %297 = vector.extract_strided_slice %282 {offsets = [0, 384], sizes = [8, 128], strides = [1, 1]} : vector<8x512xf32> to vector<8x128xf32>
    %298 = arith.negf %297 : vector<8x128xf32>
    %299 = math.exp %298 : vector<8x128xf32>
    %cst_74 = arith.constant 1.000000e+00 : f32
    %300 = vector.broadcast %cst_74 : f32 to vector<8x128xf32>
    %301 = arith.addf %300, %299 : vector<8x128xf32>
    %302 = arith.divf %300, %301 : vector<8x128xf32>
    %303 = arith.mulf %294, %269 : vector<8x128xf32>
    %304 = arith.mulf %288, %296 : vector<8x128xf32>
    %305 = arith.addf %303, %304 : vector<8x128xf32>
    %306 = math.tanh %305 : vector<8x128xf32>
    %307 = arith.mulf %302, %306 : vector<8x128xf32>
    %308 = vector.broadcast %c6_i32 : i32 to vector<8x1xi32>
    %309 = arith.cmpi slt, %308, %10 : vector<8x1xi32>
    %310 = vector.shape_cast %309 : vector<8x1xi1> to vector<8x1xi1>
    %311 = vector.broadcast %310 : vector<8x1xi1> to vector<8x128xi1>
    %312 = arith.select %311, %307, %268 : vector<8x128xi1>, vector<8x128xf32>
    %313 = arith.select %311, %305, %269 : vector<8x128xi1>, vector<8x128xf32>
    %cst_75 = arith.constant 0.000000e+00 : f32
    %314 = vector.broadcast %cst_75 : f32 to vector<8x128xf32>
    %315 = arith.select %311, %307, %314 : vector<8x128xi1>, vector<8x128xf32>
    %316 = arith.truncf %315 : vector<8x128xf32> to vector<8x128xbf16>
    %317 = arith.index_cast %c6_i32 : i32 to index
    %c0_76 = arith.constant 0 : index
    %c0_77 = arith.constant 0 : index
    %318 = vector.load %arg13[%317, %c0_76, %c0_77] : memref<8x8x128xbf16, #tpu.memory_space<vmem>>, vector<1x8x128xbf16>
    %319 = vector.shape_cast %318 : vector<1x8x128xbf16> to vector<8x128xbf16>
    %320 = vector.shape_cast %316 : vector<8x128xbf16> to vector<1x8x128xbf16>
    tpu.vector_store %arg13[%317, %c0_76, %c0_77], %320 {strides = array<i32>} : memref<8x8x128xbf16, #tpu.memory_space<vmem>>, vector<1x8x128xbf16>,
    %c7_i32 = arith.constant 7 : i32
    %321 = arith.index_cast %c7_i32 : i32 to index
    %c0_78 = arith.constant 0 : index
    %c0_79 = arith.constant 0 : index
    %322 = vector.load %arg12[%321, %c0_78, %c0_79] : memref<8x8x512xf32, #tpu.memory_space<vmem>>, vector<1x8x512xf32>
    %323 = vector.shape_cast %322 : vector<1x8x512xf32> to vector<8x512xf32>
    %324 = arith.truncf %312 : vector<8x128xf32> to vector<8x128xbf16>
    %cst_80 = arith.constant dense<0.000000e+00> : vector<8x512xf32>
    %325 = tpu.matmul %324, %9, %cst_80 {dimension_numbers = #tpu.dot_dimension_numbers<[1], [0], [0], [1], [0, 0, 1, 1], [], []>} : vector<8x128xbf16>, vector<128x512xbf16>, vector<8x512xf32> -> vector<8x512xf32>
    %326 = arith.addf %323, %325 : vector<8x512xf32>
    %327 = vector.extract_strided_slice %326 {offsets = [0, 0], sizes = [8, 128], strides = [1, 1]} : vector<8x512xf32> to vector<8x128xf32>
    %328 = arith.negf %327 : vector<8x128xf32>
    %329 = math.exp %328 : vector<8x128xf32>
    %cst_81 = arith.constant 1.000000e+00 : f32
    %330 = vector.broadcast %cst_81 : f32 to vector<8x128xf32>
    %331 = arith.addf %330, %329 : vector<8x128xf32>
    %332 = arith.divf %330, %331 : vector<8x128xf32>
    %333 = vector.extract_strided_slice %326 {offsets = [0, 128], sizes = [8, 128], strides = [1, 1]} : vector<8x512xf32> to vector<8x128xf32>
    %334 = arith.negf %333 : vector<8x128xf32>
    %335 = math.exp %334 : vector<8x128xf32>
    %cst_82 = arith.constant 1.000000e+00 : f32
    %336 = vector.broadcast %cst_82 : f32 to vector<8x128xf32>
    %337 = arith.addf %336, %335 : vector<8x128xf32>
    %338 = arith.divf %336, %337 : vector<8x128xf32>
    %339 = vector.extract_strided_slice %326 {offsets = [0, 256], sizes = [8, 128], strides = [1, 1]} : vector<8x512xf32> to vector<8x128xf32>
    %340 = math.tanh %339 : vector<8x128xf32>
    %341 = vector.extract_strided_slice %326 {offsets = [0, 384], sizes = [8, 128], strides = [1, 1]} : vector<8x512xf32> to vector<8x128xf32>
    %342 = arith.negf %341 : vector<8x128xf32>
    %343 = math.exp %342 : vector<8x128xf32>
    %cst_83 = arith.constant 1.000000e+00 : f32
    %344 = vector.broadcast %cst_83 : f32 to vector<8x128xf32>
    %345 = arith.addf %344, %343 : vector<8x128xf32>
    %346 = arith.divf %344, %345 : vector<8x128xf32>
    %347 = arith.mulf %338, %313 : vector<8x128xf32>
    %348 = arith.mulf %332, %340 : vector<8x128xf32>
    %349 = arith.addf %347, %348 : vector<8x128xf32>
    %350 = math.tanh %349 : vector<8x128xf32>
    %351 = arith.mulf %346, %350 : vector<8x128xf32>
    %352 = vector.broadcast %c7_i32 : i32 to vector<8x1xi32>
    %353 = arith.cmpi slt, %352, %10 : vector<8x1xi32>
    %354 = vector.shape_cast %353 : vector<8x1xi1> to vector<8x1xi1>
    %355 = vector.broadcast %354 : vector<8x1xi1> to vector<8x128xi1>
    %356 = arith.select %355, %351, %312 : vector<8x128xi1>, vector<8x128xf32>
    %357 = arith.select %355, %349, %313 : vector<8x128xi1>, vector<8x128xf32>
    %cst_84 = arith.constant 0.000000e+00 : f32
    %358 = vector.broadcast %cst_84 : f32 to vector<8x128xf32>
    %359 = arith.select %355, %351, %358 : vector<8x128xi1>, vector<8x128xf32>
    %360 = arith.truncf %359 : vector<8x128xf32> to vector<8x128xbf16>
    %361 = arith.index_cast %c7_i32 : i32 to index
    %c0_85 = arith.constant 0 : index
    %c0_86 = arith.constant 0 : index
    %362 = vector.load %arg13[%361, %c0_85, %c0_86] : memref<8x8x128xbf16, #tpu.memory_space<vmem>>, vector<1x8x128xbf16>
    %363 = vector.shape_cast %362 : vector<1x8x128xbf16> to vector<8x128xbf16>
    %364 = vector.shape_cast %360 : vector<8x128xbf16> to vector<1x8x128xbf16>
    tpu.vector_store %arg13[%361, %c0_85, %c0_86], %364 {strides = array<i32>} : memref<8x8x128xbf16, #tpu.memory_space<vmem>>, vector<1x8x128xbf16>,
    %c8_i32 = arith.constant 8 : i32
    %c0_87 = arith.constant 0 : index
    %c0_88 = arith.constant 0 : index
    %c0_89 = arith.constant 0 : index
    %365 = vector.load %arg13[%c0_87, %c0_88, %c0_89] : memref<8x8x128xbf16, #tpu.memory_space<vmem>>, vector<8x8x128xbf16>
    %366 = vector.shape_cast %365 : vector<8x8x128xbf16> to vector<64x128xbf16>
    %c0_90 = arith.constant 0 : index
    %c0_91 = arith.constant 0 : index
    %367 = vector.load %arg6[%c0_90, %c0_91] : memref<128x128xbf16, #tpu.memory_space<vmem>>, vector<128x128xbf16>
    %cst_92 = arith.constant dense<0.000000e+00> : vector<64x128xf32>
    %368 = tpu.matmul %366, %367, %cst_92 {dimension_numbers = #tpu.dot_dimension_numbers<[1], [0], [0], [1], [0, 0, 1, 1], [], []>} : vector<64x128xbf16>, vector<128x128xbf16>, vector<64x128xf32> -> vector<64x128xf32>
    %c0_93 = arith.constant 0 : index
    %c0_94 = arith.constant 0 : index
    %369 = vector.load %arg7[%c0_93, %c0_94] : memref<1x128xf32, #tpu.memory_space<vmem>>, vector<1x128xf32>
    %370 = vector.broadcast %369 : vector<1x128xf32> to vector<64x128xf32>
    %371 = arith.addf %368, %370 : vector<64x128xf32>
    %372 = vector.shape_cast %371 : vector<64x128xf32> to vector<8x8x128xf32>
    %c0_95 = arith.constant 0 : index
    %c0_96 = arith.constant 0 : index
    %c0_97 = arith.constant 0 : index
    %373 = vector.load %arg10[%c0_95, %c0_96, %c0_97] : memref<8x8x128xf32, #tpu.memory_space<vmem>>, vector<8x8x128xf32>
    tpu.vector_store %arg10[%c0_95, %c0_96, %c0_97], %372 {strides = array<i32>} : memref<8x8x128xf32, #tpu.memory_space<vmem>>, vector<8x8x128xf32>,
    %c0_98 = arith.constant 0 : index
    %c0_99 = arith.constant 0 : index
    %374 = vector.load %arg8[%c0_98, %c0_99] : memref<128x128xbf16, #tpu.memory_space<vmem>>, vector<128x128xbf16>
    %c0_100 = arith.constant 0 : index
    %c0_101 = arith.constant 0 : index
    %375 = vector.load %arg9[%c0_100, %c0_101] : memref<1x128xf32, #tpu.memory_space<vmem>>, vector<1x128xf32>
    %376 = arith.truncf %356 : vector<8x128xf32> to vector<8x128xbf16>
    %cst_102 = arith.constant dense<0.000000e+00> : vector<8x128xf32>
    %377 = tpu.matmul %376, %374, %cst_102 {dimension_numbers = #tpu.dot_dimension_numbers<[1], [0], [0], [1], [0, 0, 1, 1], [], []>} : vector<8x128xbf16>, vector<128x128xbf16>, vector<8x128xf32> -> vector<8x128xf32>
    %378 = vector.broadcast %375 : vector<1x128xf32> to vector<8x128xf32>
    %379 = arith.addf %377, %378 : vector<8x128xf32>
    %c0_103 = arith.constant 0 : index
    %c0_104 = arith.constant 0 : index
    %380 = vector.load %arg11[%c0_103, %c0_104] : memref<8x128xf32, #tpu.memory_space<vmem>>, vector<8x128xf32>
    tpu.vector_store %arg11[%c0_103, %c0_104], %379 {strides = array<i32>} : memref<8x128xf32, #tpu.memory_space<vmem>>, vector<8x128xf32>,
    return
  }
  func.func @transform_0(%arg0: i32) -> (i32, i32, i32) {
    %c0_i32 = arith.constant 0 : i32
    %c0_i32_0 = arith.constant 0 : i32
    %c0_i32_1 = arith.constant 0 : i32
    return %c0_i32, %arg0, %c0_i32_0 : i32, i32, i32
  }
  func.func @transform_1(%arg0: i32) -> (i32, i32) {
    %c0_i32 = arith.constant 0 : i32
    %c0_i32_0 = arith.constant 0 : i32
    return %arg0, %c0_i32 : i32, i32
  }
  func.func @transform_2(%arg0: i32) -> (i32, i32) {
    %c0_i32 = arith.constant 0 : i32
    %c0_i32_0 = arith.constant 0 : i32
    %c0_i32_1 = arith.constant 0 : i32
    return %c0_i32, %c0_i32_0 : i32, i32
  }
  func.func @transform_3(%arg0: i32) -> (i32, i32) {
    %c0_i32 = arith.constant 0 : i32
    %c0_i32_0 = arith.constant 0 : i32
    %c0_i32_1 = arith.constant 0 : i32
    return %c0_i32, %c0_i32_0 : i32, i32
  }
  func.func @transform_4(%arg0: i32) -> (i32, i32) {
    %c0_i32 = arith.constant 0 : i32
    %c0_i32_0 = arith.constant 0 : i32
    %c0_i32_1 = arith.constant 0 : i32
    return %c0_i32, %c0_i32_0 : i32, i32
  }
  func.func @transform_5(%arg0: i32) -> (i32, i32) {
    %c0_i32 = arith.constant 0 : i32
    %c0_i32_0 = arith.constant 0 : i32
    %c0_i32_1 = arith.constant 0 : i32
    return %c0_i32, %c0_i32_0 : i32, i32
  }
  func.func @transform_6(%arg0: i32) -> (i32, i32) {
    %c0_i32 = arith.constant 0 : i32
    %c0_i32_0 = arith.constant 0 : i32
    %c0_i32_1 = arith.constant 0 : i32
    return %c0_i32, %c0_i32_0 : i32, i32
  }
  func.func @transform_7(%arg0: i32) -> (i32, i32) {
    %c0_i32 = arith.constant 0 : i32
    %c0_i32_0 = arith.constant 0 : i32
    %c0_i32_1 = arith.constant 0 : i32
    return %c0_i32, %c0_i32_0 : i32, i32
  }
  func.func @transform_8(%arg0: i32) -> (i32, i32) {
    %c0_i32 = arith.constant 0 : i32
    %c0_i32_0 = arith.constant 0 : i32
    %c0_i32_1 = arith.constant 0 : i32
    return %c0_i32, %c0_i32_0 : i32, i32
  }
  func.func @transform_9(%arg0: i32) -> (i32, i32, i32) {
    %c0_i32 = arith.constant 0 : i32
    %c0_i32_0 = arith.constant 0 : i32
    %c0_i32_1 = arith.constant 0 : i32
    return %c0_i32, %arg0, %c0_i32_0 : i32, i32, i32
  }
  func.func @transform_10(%arg0: i32) -> (i32, i32) {
    %c0_i32 = arith.constant 0 : i32
    %c0_i32_0 = arith.constant 0 : i32
    return %arg0, %c0_i32 : i32, i32
  }
}

</mosaic_0001>

<bundles_post_ra>
// kernel: tpu_custom_call.1
= control target key start
LH: loop header
LB: loop body
LE: loop exit
PB: predicated region body
PF: predicated region fallthrough
CT: control target
= control target key end

     0   :  { %16 = vsyncpa [#allocation5], 0  ;;  %s3444_s0 = inlined_call_operand.hbm [shape: bf16[8,8,128], index: 0, kind: input, shape index: {}]   ;;  %s3445_s1 = inlined_call_operand.vmem [shape: s32[8,1], index: 1, kind: input, shape index: {}]   ;;  %s3446_s2 = inlined_call_operand.hbm [shape: bf16[128,512], index: 2, kind: input, shape index: {}]   ;;  %s3447_s3 = inlined_call_operand.hbm [shape: bf16[128,512], index: 3, kind: input, shape index: {}]   ;;  %s3448_s4 = inlined_call_operand.vmem [shape: f32[1,512], index: 4, kind: input, shape index: {}]   ;;  %s3449_s5 = inlined_call_operand.hbm [shape: bf16[128,128], index: 5, kind: input, shape index: {}]   ;;  %s3450_s6 = inlined_call_operand.vmem [shape: f32[1,128], index: 6, kind: input, shape index: {}]   ;;  %s3451_s7 = inlined_call_operand.hbm [shape: bf16[128,128], index: 7, kind: input, shape index: {}]   ;;  %s3452_s8 = inlined_call_operand.vmem [shape: f32[1,128], index: 8, kind: input, shape index: {}]   ;;  %s3453_s9 = inlined_call_operand.hbm [shape: f32[8,8,128], index: 9, kind: output, shape index: {0}]   ;;  %s3454_s10 = inlined_call_operand.hbm [shape: f32[8,128], index: 10, kind: output, shape index: {1}]  }
   0x1   :  { %17 = vsyncpa [#allocation8], 0 }
   0x2   :  { %18 = vsyncpa [#allocation11], 0 }
   0x3   :  { %19 = vsyncpa [#allocation6], 0 }
   0x4   :  { %20 = vsyncpa [#allocation15], 0  ;;  %s2695_s13 = smov [#allocation7]  }
   0x5   :  { %s40_s14 = sshll.u32 %s2695_s13, 4  ;;  %s41_s14 = int_to_ptr.vmem [resolvable:$true] %s40_s14 }
   0x6   :  { %s2553_s15 = scalar_lea.vmem %s41_s14, 4096  ;;  %p2558_p1 = scmp.lt.s32.totalorder %s41_s14, %s41_s14 }
   0x7   :  { %p2554_p0 = scmp.ne.s32.totalorder %s41_s14, %s2553_s15  ;;  %p2559_p2 = scmp.lt.s32.totalorder %s2553_s15, %s2553_s15 }
   0x9   :  { %p2560_p3 = por %p2559_p2, %p2558_p1 }
   0xb   :  { %p2561_p4 = pnand %p2560_p3, %p2554_p0 }
   0xd   :  { %2564 = shalt.err (!%p2561_p4)
}
   0xe   :  { %s2696_s16 = smov 256   ;;  %s2697_s17 = smov 16  }
   0xf   :  { %46 = dma.hbm_to_vmem [thread:$0]  %s3446_s2, 4096, %s41_s14, [#allocation8], %s2696_s16, %s2696_s16, %s2697_s17  }
  0x10   :  { %s2698_s20 = smov [#allocation10]   ;;  %s2699_s22 = smov [#allocation4]  }
  0x11   :  { %s66_s21 = sshll.u32 %s2698_s20, 4  ;;  %s26_s23 = sshll.u32 %s2699_s22, 4  ;;  %s67_s21 = int_to_ptr.vmem [resolvable:$true] %s66_s21  ;;  %s27_s23 = int_to_ptr.vmem [resolvable:$true] %s26_s23 }
  0x12   :  { %s2573_s24 = scalar_lea.vmem %s67_s21, 1024  ;;  %p2578_p6 = scmp.lt.s32.totalorder %s67_s21, %s67_s21 }
  0x13   :  { %p2574_p5 = scmp.ne.s32.totalorder %s67_s21, %s2573_s24  ;;  %p2579_p7 = scmp.lt.s32.totalorder %s2573_s24, %s2573_s24 }
  0x15   :  { %p2580_p8 = por %p2579_p7, %p2578_p6 }
  0x17   :  { %p2581_p9 = pnand %p2580_p8, %p2574_p5 }
  0x19   :  { %2584 = shalt.err (!%p2581_p9)
}
  0x1a   :  { %s2700_s25 = smov 64   ;;  %s2701_s26 = smov 4  }
  0x1b   :  { %72 = dma.hbm_to_vmem [thread:$0]  %s3449_s5, 1024, %s67_s21, [#allocation11], %s2700_s25, %s2700_s25, %s2701_s26  }
  0x1c   :  { %s2593_s2 = scalar_lea.vmem %s27_s23, 512  ;;  %p2598_p11 = scmp.lt.s32.totalorder %s27_s23, %s27_s23 }
  0x1d   :  { %p2594_p10 = scmp.ne.s32.totalorder %s27_s23, %s2593_s2  ;;  %p2599_p12 = scmp.lt.s32.totalorder %s2593_s2, %s2593_s2 }
  0x1f   :  { %p2600_p13 = por %p2599_p12, %p2598_p11 }
  0x21   :  { %p2601_p0 = pnand %p2600_p13, %p2594_p10 }
  0x23   :  { %2604 = shalt.err (!%p2601_p0)
}
  0x24   :  { %32 = dma.hbm_to_vmem [thread:$0]  %s3444_s0, 512, %s27_s23, [#allocation5], %s2700_s25, %s2700_s25, %s2701_s26  }
  0x25   :  { %s2702_s11 = smov [#allocation9]   ;;  %s2703_s13 = smov [#allocation12]  }
  0x26   :  { %s52_s12 = sshll.u32 %s2702_s11, 4  ;;  %s80_s5 = sshll.u32 %s2703_s13, 4  ;;  %s53_s12 = int_to_ptr.vmem [resolvable:$true] %s52_s12  ;;  %s81_s5 = int_to_ptr.vmem [resolvable:$true] %s80_s5 }
  0x27   :  { %s2613_s14 = scalar_lea.vmem %s53_s12, 4096  ;;  %p2618_p2 = scmp.lt.s32.totalorder %s53_s12, %s53_s12 }
  0x28   :  { %p2614_p1 = scmp.ne.s32.totalorder %s53_s12, %s2613_s14  ;;  %p2619_p3 = scmp.lt.s32.totalorder %s2613_s14, %s2613_s14 }
  0x2a   :  { %p2620_p4 = por %p2619_p3, %p2618_p2 }
  0x2c   :  { %p2621_p5 = pnand %p2620_p4, %p2614_p1 }
  0x2e   :  { %2624 = shalt.err (!%p2621_p5)
}
  0x2f   :  { %58 = dma.hbm_to_vmem [thread:$0]  %s3447_s3, 4096, %s53_s12, [#allocation8], %s2696_s16, %s2696_s16, %s2697_s17  }
  0x30   :  { %s2633_s0 = scalar_lea.vmem %s81_s5, 1024  ;;  %p2638_p7 = scmp.lt.s32.totalorder %s81_s5, %s81_s5 }
  0x31   :  { %p2634_p6 = scmp.ne.s32.totalorder %s81_s5, %s2633_s0  ;;  %p2639_p8 = scmp.lt.s32.totalorder %s2633_s0, %s2633_s0 }
  0x33   :  { %p2640_p9 = por %p2639_p8, %p2638_p7 }
  0x35   :  { %p2641_p10 = pnand %p2640_p9, %p2634_p6 }
  0x37   :  { %2644 = shalt.err (!%p2641_p10)
}
  0x38   :  { %86 = dma.hbm_to_vmem [thread:$0]  %s3451_s7, 1024, %s81_s5, [#allocation11], %s2700_s25, %s2700_s25, %s2701_s26  }
  0x39   :  { %2685 = dma.done.wait [#allocation5], 512  }
  0x3a   :  { %2686 = vsyncadd [#allocation5], 4294966784 }
  0x3b   :  { %2687 = dma.done.wait [#allocation8], 8192  }
  0x3c   :  { %2688 = vsyncadd [#allocation8], 4294959104 }
  0x3d   :  { %2689 = dma.done.wait [#allocation11], 2048  }
  0x3e   :  { %2690 = vsyncadd [#allocation11], 4294965248  ;;  %v3455_v0 = vmov 0   ;;  %v2265_v1 = vld [vmem:[#allocation7 + $0xe4] ss:$16 sps:$4 sm:$0xff]   ;;  %v2326_v44 = vld [vmem:[#allocation4 + $0x8] sm:$0xff]  }
  0x3f   :  { %383 = vmatprep.mubr.bf16.mxu0 %v3455_v0  ;;  %456 = vmatprep.mubr.bf16.mxu1 %v3455_v0  ;;  %v2267_v2 = vld [vmem:[#allocation7 + $0xec] ss:$16 sps:$4 sm:$0xff]   ;;  %v2269_v3 = vld [vmem:[#allocation7 + $0xe0] ss:$16 sps:$4 sm:$0xff]   ;;  %v2270_v4 = vld [vmem:[#allocation7 + $0xe8] ss:$16 sps:$4 sm:$0xff]  }
  0x40   :  { %2263 = vset.pattern.permute.xlu0 %v3455_v0  ;;  %2264 = vset.pattern.permute.xlu1 %v3455_v0  ;;  %v2271_v5 = vld [vmem:[#allocation7 + $0xc4] ss:$16 sps:$4 sm:$0xff]   ;;  %v2273_v6 = vld [vmem:[#allocation7 + $0xcc] ss:$16 sps:$4 sm:$0xff]   ;;  %v2275_v7 = vld [vmem:[#allocation7 + $0xc0] ss:$16 sps:$4 sm:$0xff]  }
  0x41   :  { %351 = vmatprep.subr.bf16.mxu0 %v2265_v1  ;;  %424 = vmatprep.subr.bf16.mxu1 %v2267_v2  ;;  %v2276_v8 = vld [vmem:[#allocation7 + $0xc8] ss:$16 sps:$4 sm:$0xff]   ;;  %v2277_v9 = vld [vmem:[#allocation7 + $0xa4] ss:$16 sps:$4 sm:$0xff]   ;;  %v2279_v10 = vld [vmem:[#allocation7 + $0xac] ss:$16 sps:$4 sm:$0xff]  }
  0x42   :  { %352 = vmatpush1.bf16.msra.mxu0 %v2269_v3  ;;  %425 = vmatpush1.bf16.msra.mxu1 %v2270_v4  ;;  %v2281_v11 = vld [vmem:[#allocation7 + $0xa0] ss:$16 sps:$4 sm:$0xff]   ;;  %v2282_v12 = vld [vmem:[#allocation7 + $0xa8] ss:$16 sps:$4 sm:$0xff]   ;;  %v2283_v13 = vld [vmem:[#allocation7 + $0x84] ss:$16 sps:$4 sm:$0xff]  }
  0x43   :  { %353 = vmatprep.subr.bf16.mxu0 %v2271_v5  ;;  %426 = vmatprep.subr.bf16.mxu1 %v2273_v6  ;;  %v2285_v14 = vld [vmem:[#allocation7 + $0x8c] ss:$16 sps:$4 sm:$0xff]   ;;  %v2287_v15 = vld [vmem:[#allocation7 + $0x80] ss:$16 sps:$4 sm:$0xff]   ;;  %v2288_v16 = vld [vmem:[#allocation7 + $0x88] ss:$16 sps:$4 sm:$0xff]  }
  0x44   :  { %v2289_v17 = vld [vmem:[#allocation7 + $0x64] ss:$16 sps:$4 sm:$0xff]   ;;  %v2291_v18 = vld [vmem:[#allocation7 + $0x6c] ss:$16 sps:$4 sm:$0xff]   ;;  %v2293_v19 = vld [vmem:[#allocation7 + $0x60] ss:$16 sps:$4 sm:$0xff]  }
  0x45   :  { %v2294_v20 = vld [vmem:[#allocation7 + $0x68] ss:$16 sps:$4 sm:$0xff]   ;;  %v2295_v21 = vld [vmem:[#allocation7 + $0x44] ss:$16 sps:$4 sm:$0xff]   ;;  %v2297_v22 = vld [vmem:[#allocation7 + $0x4c] ss:$16 sps:$4 sm:$0xff]  }
  0x46   :  { %354 = vmatpush1.bf16.msra.mxu0 %v2275_v7  ;;  %427 = vmatpush1.bf16.msra.mxu1 %v2276_v8  ;;  %v2299_v23 = vld [vmem:[#allocation7 + $0x40] ss:$16 sps:$4 sm:$0xff]   ;;  %v2300_v24 = vld [vmem:[#allocation7 + $0x48] ss:$16 sps:$4 sm:$0xff]   ;;  %v2301_v25 = vld [vmem:[#allocation7 + $0x24] ss:$16 sps:$4 sm:$0xff]  }
  0x47   :  { %355 = vmatprep.subr.bf16.mxu0 %v2277_v9  ;;  %428 = vmatprep.subr.bf16.mxu1 %v2279_v10  ;;  %v2303_v26 = vld [vmem:[#allocation7 + $0x2c] ss:$16 sps:$4 sm:$0xff]   ;;  %v2305_v27 = vld [vmem:[#allocation7 + $0x20] ss:$16 sps:$4 sm:$0xff]   ;;  %v2306_v28 = vld [vmem:[#allocation7 + $0x28] ss:$16 sps:$4 sm:$0xff]  }
  0x48   :  { %v2307_v29 = vld [vmem:[#allocation7 + $0x4] ss:$16 sps:$4 sm:$0xff]   ;;  %v2309_v30 = vld [vmem:[#allocation7 + $0xc] ss:$16 sps:$4 sm:$0xff]   ;;  %v2311_v31 = vld [vmem:[#allocation7] ss:$16 sps:$4 sm:$0xff]  }
  0x49   :  { %v2312_v32 = vld [vmem:[#allocation7 + $0x8] ss:$16 sps:$4 sm:$0xff]   ;;  %v2800_v33 = vld [vmem:[#allocation9 + $0xe4] ss:$16 sps:$4 sm:$0xff]   ;;  %v2802_v34 = vld [vmem:[#allocation9 + $0xec] ss:$16 sps:$4 sm:$0xff]  }
  0x4a   :  { %356 = vmatpush1.bf16.msra.mxu0 %v2281_v11  ;;  %429 = vmatpush1.bf16.msra.mxu1 %v2282_v12  ;;  %v2313_v35 = vld [vmem:[#allocation4] sm:$0xff]   ;;  %v2806_v37 = vld [vmem:[#allocation9 + $0xe8] ss:$16 sps:$4 sm:$0xff]   ;;  %v2812_v39 = vld [vmem:[#allocation9 + $0xcc] ss:$16 sps:$4 sm:$0xff]   ;;  %v147_v11 = vlaneseq  ;;  %s2707_s22 = smov [#allocation14]  }
  0x4b   :  { %357 = vmatprep.subr.bf16.mxu0 %v2283_v13  ;;  %430 = vmatprep.subr.bf16.mxu1 %v2285_v14  ;;  %v2804_v36 = vld [vmem:[#allocation9 + $0xe0] ss:$16 sps:$4 sm:$0xff]   ;;  %v2810_v38 = vld [vmem:[#allocation9 + $0xc4] ss:$16 sps:$4 sm:$0xff]   ;;  %v2818_v41 = vld [vmem:[#allocation9 + $0xc8] ss:$16 sps:$4 sm:$0xff]  }
  0x4c   :  { %v2814_v40 = vld [vmem:[#allocation9 + $0xc0] ss:$16 sps:$4 sm:$0xff]   ;;  %v2822_v42 = vld [vmem:[#allocation9 + $0xa4] ss:$16 sps:$4 sm:$0xff]   ;;  %v2824_v43 = vld [vmem:[#allocation9 + $0xac] ss:$16 sps:$4 sm:$0xff]  }
  0x4d   :  { %v2828_v45 = vld [vmem:[#allocation9 + $0xa0] ss:$16 sps:$4 sm:$0xff]   ;;  %v2830_v46 = vld [vmem:[#allocation9 + $0xa8] ss:$16 sps:$4 sm:$0xff]   ;;  %v2834_v47 = vld [vmem:[#allocation9 + $0x84] ss:$16 sps:$4 sm:$0xff]  }
  0x4e   :  { %358 = vmatpush1.bf16.msra.mxu0 %v2287_v15  ;;  %431 = vmatpush1.bf16.msra.mxu1 %v2288_v16  ;;  %v2838_v48 = vld [vmem:[#allocation9 + $0x8c] ss:$16 sps:$4 sm:$0xff]   ;;  %v2840_v49 = vld [vmem:[#allocation9 + $0x80] ss:$16 sps:$4 sm:$0xff]   ;;  %v2842_v50 = vld [vmem:[#allocation9 + $0x88] ss:$16 sps:$4 sm:$0xff]  }
  0x4f   :  { %359 = vmatprep.subr.bf16.mxu0 %v2289_v17  ;;  %432 = vmatprep.subr.bf16.mxu1 %v2291_v18  ;;  %v2846_v51 = vld [vmem:[#allocation9 + $0x64] ss:$16 sps:$4 sm:$0xff]   ;;  %v2850_v52 = vld [vmem:[#allocation9 + $0x6c] ss:$16 sps:$4 sm:$0xff]   ;;  %v2854_v54 = vld [vmem:[#allocation9 + $0x60] ss:$16 sps:$4 sm:$0xff]  }
  0x50   :  { %v2339_v53 = vld [vmem:[#allocation4 + $0x10] sm:$0xff]   ;;  %v2859_v55 = vld [vmem:[%s3445_s1] sm:$0xff]  ;;  %v2861_v56 = vld [vmem:[#allocation9 + $0x68] ss:$16 sps:$4 sm:$0xff]   ;;  %v148_v12 = vshrl.u32 %v147_v11, 7  ;;  %s2047_s23 = sshll.u32 %s2707_s22, 4  ;;  %s2048_s23 = int_to_ptr.vmem [resolvable:$true] %s2047_s23 }
  0x51   :  { %v2863_v57 = vld [vmem:[#allocation9 + $0x44] ss:$16 sps:$4 sm:$0xff]   ;;  %vm836_vm0 = vcmp.gt.s32.totalorder %v2859_v55, 0  ;;  %vm961_vm1 = vcmp.gt.s32.totalorder %v2859_v55, 1  ;;  %v2869_v58 = vld [vmem:[#allocation9 + $0x4c] ss:$16 sps:$4 sm:$0xff]   ;;  %p2650_p12 = scmp.lt.s32.totalorder %s2048_s23, %s2048_s23 }
  0x52   :  { %360 = vmatpush1.bf16.msra.mxu0 %v2293_v19  ;;  %433 = vmatpush1.bf16.msra.mxu1 %v2294_v20  ;;  %v837_v59 = vsel %vm836_vm0, 1, %v3455_v0  ;;  %v962_v60 = vsel %vm961_vm1, 1, %v3455_v0  ;;  %vm1345_vm2 = vcmp.gt.s32.totalorder %v2859_v55, 4  ;;  %v2876_v61 = vld [vmem:[#allocation9 + $0x40] ss:$16 sps:$4 sm:$0xff]   ;;  %v2352_v2 = vld [vmem:[#allocation4 + $0x18] sm:$0xff]  }
  0x53   :  { %361 = vmatprep.subr.bf16.mxu0 %v2295_v21  ;;  %434 = vmatprep.subr.bf16.mxu1 %v2297_v22  ;;  %v2878_v62 = vld [vmem:[#allocation9 + $0x48] ss:$16 sps:$4 sm:$0xff]   ;;  %v2880_v63 = vld [vmem:[#allocation9 + $0x24] ss:$16 sps:$4 sm:$0xff]   ;;  %v2882_v1 = vld [vmem:[#allocation9 + $0x2c] ss:$16 sps:$4 sm:$0xff]  }
  0x54   :  { %839 = vperm.xlu0 %2263, %v837_v59   ;;  %v2890_v3 = vld [vmem:[#allocation9 + $0x20] ss:$16 sps:$4 sm:$0xff]   ;;  %v2892_v4 = vld [vmem:[#allocation9 + $0x28] ss:$16 sps:$4 sm:$0xff]   ;;  %v2894_v5 = vld [vmem:[#allocation9 + $0x4] ss:$16 sps:$4 sm:$0xff]  }
  0x55   :  { %v2896_v6 = vld [vmem:[#allocation9 + $0xc] ss:$16 sps:$4 sm:$0xff]   ;;  %v2904_v7 = vld [vmem:[#allocation9] ss:$16 sps:$4 sm:$0xff]   ;;  %v2906_v8 = vld [vmem:[#allocation9 + $0x8] ss:$16 sps:$4 sm:$0xff]  }
  0x56   :  { %362 = vmatpush1.bf16.msra.mxu0 %v2299_v23  ;;  %435 = vmatpush1.bf16.msra.mxu1 %v2300_v24  ;;  %v1346_v9 = vsel %vm1345_vm2, 1, %v3455_v0  ;;  %vm1601_vm3 = vcmp.gt.s32.totalorder %v2859_v55, 6  ;;  %v157_v13 = vsub.s32 2, %v148_v12  ;;  %v149_v14 = vsub.s32 0, %v148_v12  ;;  %v145_v16 = vld [vmem:[%s3448_s4] sm:$0xf] }
  0x57   :  { %363 = vmatprep.subr.bf16.mxu0 %v2301_v25  ;;  %436 = vmatprep.subr.bf16.mxu1 %v2303_v26  ;;  %v1602_v10 = vsel %vm1601_vm3, 1, %v3455_v0  ;;  %v161_v15 = vsub.s32 3, %v148_v12  ;;  %v153_v20 = vsub.s32 1, %v148_v12  ;;  %vm1089_vm6 = vcmp.gt.s32.totalorder %v2859_v55, 2  ;;  %s2645_s24 = scalar_lea.vmem %s2048_s23, 128 }
  0x58   :  { %964 = vperm.xlu0 %2263, %v962_v60   ;;  %v2964_v19 = vrot.slane %v145_v16, %v157_v13  ;;  %v150_v23 = vrot.slane %v145_v16, %v149_v14  ;;  %vm1217_vm7 = vcmp.gt.s32.totalorder %v2859_v55, 3  ;;  %vm1473_vm8 = vcmp.gt.s32.totalorder %v2859_v55, 5  ;;  %p2646_p11 = scmp.ne.s32.totalorder %s2048_s23, %s2645_s24  ;;  %p2651_p13 = scmp.lt.s32.totalorder %s2645_s24, %s2645_s24 }
  0x59   :  { %v2970_v24 = vrot.slane %v145_v16, %v161_v15  ;;  %vm1729_vm9 = vcmp.gt.s32.totalorder %v2859_v55, 7  ;;  %vm2706_vm0 = vmmov 0  }
  0x5a   :  { %364 = vmatpush1.bf16.msra.mxu0 %v2305_v27  ;;  %437 = vmatpush1.bf16.msra.mxu1 %v2306_v28  ;;  %v154_v27 = vrot.slane %v145_v16, %v153_v20  ;;  %p2652_p0 = por %p2651_p13, %p2650_p12 }
  0x5b   :  { %365 = vmatprep.subr.bf16.mxu0 %v2307_v29  ;;  %438 = vmatprep.subr.bf16.mxu1 %v2309_v30 }
  0x5c   :  { %1348 = vperm.xlu0 %2263, %v1346_v9   ;;  %p2653_p1 = pnand %p2652_p0, %p2646_p11 }
  0x5e   :  { %366 = vmatpush1.bf16.msra.mxu0 %v2311_v31  ;;  %439 = vmatpush1.bf16.msra.mxu1 %v2312_v32 }
  0x5f   :  { %726 = vmatprep.subr.bf16.mxu0 %v2800_v33  ;;  %767 = vmatprep.subr.bf16.mxu1 %v2802_v34 }
  0x60   :  { %1604 = vperm.xlu0 %2263, %v1602_v10  }
  0x61   :  { %384 = vmatmul.mubr.bf16.vlgmr.msra.gmra.mxu0 %v2313_v35  ;;  %457 = vmatmul.mubr.bf16.vlgmr.msra.gmra.mxu1 %v2313_v35 }
  0x62   :  { %727 = vmatpush1.bf16.msra.mxu0 %v2804_v36  ;;  %768 = vmatpush1.bf16.msra.mxu1 %v2806_v37 }
  0x63   :  { %728 = vmatprep.subr.bf16.mxu0 %v2810_v38  ;;  %769 = vmatprep.subr.bf16.mxu1 %v2812_v39 }
  0x64   :  { %393 = vmatprep.mubr.bf16.mxu0 %v3455_v0  ;;  %466 = vmatprep.mubr.bf16.mxu1 %v3455_v0 }
  0x66   :  { %729 = vmatpush1.bf16.msra.mxu0 %v2814_v40  ;;  %770 = vmatpush1.bf16.msra.mxu1 %v2818_v41 }
  0x67   :  { %730 = vmatprep.subr.bf16.mxu0 %v2822_v42  ;;  %771 = vmatprep.subr.bf16.mxu1 %v2824_v43 }
  0x69   :  { %394 = vmatmul.mubr.bf16.gmra.mxu0 %v2326_v44  ;;  %467 = vmatmul.mubr.bf16.gmra.mxu1 %v2326_v44 }
  0x6a   :  { %731 = vmatpush1.bf16.msra.mxu0 %v2828_v45  ;;  %772 = vmatpush1.bf16.msra.mxu1 %v2830_v46 }
  0x6b   :  { %732 = vmatprep.subr.bf16.mxu0 %v2834_v47  ;;  %773 = vmatprep.subr.bf16.mxu1 %v2838_v48 }
  0x6c   :  { %403 = vmatprep.mubr.bf16.mxu0 %v3455_v0  ;;  %476 = vmatprep.mubr.bf16.mxu1 %v3455_v0 }
  0x6e   :  { %733 = vmatpush1.bf16.msra.mxu0 %v2840_v49  ;;  %774 = vmatpush1.bf16.msra.mxu1 %v2842_v50 }
  0x6f   :  { %734 = vmatprep.subr.bf16.mxu0 %v2846_v51  ;;  %775 = vmatprep.subr.bf16.mxu1 %v2850_v52 }
  0x71   :  { %404 = vmatmul.mubr.bf16.gmra.mxu0 %v2339_v53  ;;  %477 = vmatmul.mubr.bf16.gmra.mxu1 %v2339_v53 }
  0x72   :  { %735 = vmatpush1.bf16.msra.mxu0 %v2854_v54  ;;  %776 = vmatpush1.bf16.msra.mxu1 %v2861_v56 }
  0x73   :  { %736 = vmatprep.subr.bf16.mxu0 %v2863_v57  ;;  %777 = vmatprep.subr.bf16.mxu1 %v2869_v58 }
  0x74   :  { %413 = vmatprep.mubr.bf16.mxu0 %v3455_v0  ;;  %486 = vmatprep.mubr.bf16.mxu1 %v3455_v0 }
  0x76   :  { %737 = vmatpush1.bf16.msra.mxu0 %v2876_v61  ;;  %778 = vmatpush1.bf16.msra.mxu1 %v2878_v62 }
  0x77   :  { %738 = vmatprep.subr.bf16.mxu0 %v2880_v63  ;;  %779 = vmatprep.subr.bf16.mxu1 %v2882_v1 }
  0x79   :  { %414 = vmatmul.mubr.bf16.gmra.mxu0 %v2352_v2  ;;  %487 = vmatmul.mubr.bf16.gmra.mxu1 %v2352_v2 }
  0x7a   :  { %739 = vmatpush1.bf16.msra.mxu0 %v2890_v3  ;;  %780 = vmatpush1.bf16.msra.mxu1 %v2892_v4 }
  0x7b   :  { %740 = vmatprep.subr.bf16.mxu0 %v2894_v5  ;;  %781 = vmatprep.subr.bf16.mxu1 %v2896_v6 }
  0x7c   :  { %758 = vmatprep.mubr.bf16.mxu0 %v3455_v0  ;;  %799 = vmatprep.mubr.bf16.mxu1 %v3455_v0 }
  0x7e   :  { %741 = vmatpush1.bf16.msra.mxu0 %v2904_v7  ;;  %782 = vmatpush1.bf16.msra.mxu1 %v2906_v8 }
  0x7f   :  { %851 = vmatprep.subr.bf16.mxu0 %v2800_v33  ;;  %892 = vmatprep.subr.bf16.mxu1 %v2802_v34 }
  0x81   :  { %759 = vmatmul.mubr.bf16.vlgmr.msra.gmra.mxu0 %v3455_v0  ;;  %800 = vmatmul.mubr.bf16.vlgmr.msra.gmra.mxu1 %v3455_v0 }
  0x82   :  { %852 = vmatpush1.bf16.msra.mxu0 %v2804_v36  ;;  %893 = vmatpush1.bf16.msra.mxu1 %v2806_v37 }
  0x83   :  { %853 = vmatprep.subr.bf16.mxu0 %v2810_v38  ;;  %894 = vmatprep.subr.bf16.mxu1 %v2812_v39 }
  0x84   :  { %883 = vmatprep.mubr.bf16.mxu0 %v3455_v0  ;;  %924 = vmatprep.mubr.bf16.mxu1 %v3455_v0 }
  0x86   :  { %854 = vmatpush1.bf16.msra.mxu0 %v2814_v40  ;;  %895 = vmatpush1.bf16.msra.mxu1 %v2818_v41 }
  0x87   :  { %855 = vmatprep.subr.bf16.mxu0 %v2822_v42  ;;  %896 = vmatprep.subr.bf16.mxu1 %v2824_v43 }
  0x8a   :  { %856 = vmatpush1.bf16.msra.mxu0 %v2828_v45  ;;  %897 = vmatpush1.bf16.msra.mxu1 %v2830_v46 }
  0x8b   :  { %857 = vmatprep.subr.bf16.mxu0 %v2834_v47  ;;  %898 = vmatprep.subr.bf16.mxu1 %v2838_v48 }
  0x8e   :  { %858 = vmatpush1.bf16.msra.mxu0 %v2840_v49  ;;  %899 = vmatpush1.bf16.msra.mxu1 %v2842_v50 }
  0x8f   :  { %859 = vmatprep.subr.bf16.mxu0 %v2846_v51  ;;  %900 = vmatprep.subr.bf16.mxu1 %v2850_v52 }
  0x92   :  { %860 = vmatpush1.bf16.msra.mxu0 %v2854_v54  ;;  %901 = vmatpush1.bf16.msra.mxu1 %v2861_v56 }
  0x93   :  { %861 = vmatprep.subr.bf16.mxu0 %v2863_v57  ;;  %902 = vmatprep.subr.bf16.mxu1 %v2869_v58 }
  0x96   :  { %862 = vmatpush1.bf16.msra.mxu0 %v2876_v61  ;;  %903 = vmatpush1.bf16.msra.mxu1 %v2878_v62 }
  0x97   :  { %863 = vmatprep.subr.bf16.mxu0 %v2880_v63  ;;  %904 = vmatprep.subr.bf16.mxu1 %v2882_v1 }
  0x9a   :  { %864 = vmatpush1.bf16.msra.mxu0 %v2890_v3  ;;  %905 = vmatpush1.bf16.msra.mxu1 %v2892_v4 }
  0x9b   :  { %865 = vmatprep.subr.bf16.mxu0 %v2894_v5  ;;  %906 = vmatprep.subr.bf16.mxu1 %v2896_v6 }
  0x9e   :  { %866 = vmatpush1.bf16.msra.mxu0 %v2904_v7  ;;  %907 = vmatpush1.bf16.msra.mxu1 %v2906_v8 }
  0x9f   :  { %979 = vmatprep.subr.bf16.mxu0 %v2800_v33  ;;  %1020 = vmatprep.subr.bf16.mxu1 %v2802_v34 }
 0x121   :  { %v2960_v17 = vpop.f32.mrf.mxu0  ;;  %v2962_v18 = vpop.f32.mrf.mxu1 }
 0x123   :  { %v2966_v21 = vpop.f32.mrf.mxu0  ;;  %v2968_v22 = vpop.f32.mrf.mxu1 }
 0x125   :  { %v389_v25 = vpop.f32.mrf.mxu0  ;;  %v462_v26 = vpop.f32.mrf.mxu1 }
 0x126   :  { %v2972_v28 = vadd.f32 %v389_v25, %v150_v23  ;;  %v2975_v29 = vadd.f32 %v462_v26, %v2964_v19 }
 0x127   :  { %v391_v30 = vpop.f32.mrf.mxu0  ;;  %v464_v31 = vpop.f32.mrf.mxu1 }
 0x128   :  { %v2977_v32 = vadd.f32 %v391_v30, %v154_v27  ;;  %v2980_v35 = vadd.f32 %v464_v31, %v2970_v24 }
 0x129   :  { %v395_v44 = vpop.f32.mrf.mxu0  ;;  %v468_v53 = vpop.f32.mrf.mxu1 }
 0x12a   :  { %v2982_v59 = vadd.f32 %v395_v44, %v150_v23  ;;  %v2985_v60 = vadd.f32 %v468_v53, %v2964_v19 }
 0x12b   :  { %v397_v2 = vpop.f32.mrf.mxu0  ;;  %v470_v9 = vpop.f32.mrf.mxu1 }
 0x12c   :  { %3457 = vst [vmem:[#allocation21_spill] sm:$0xff] %v2985_v60  ;;  %v2987_v10 = vadd.f32 %v397_v2, %v154_v27  ;;  %v2990_v11 = vadd.f32 %v470_v9, %v2970_v24 }
 0x12d   :  { %v399_v12 = vpop.f32.mrf.mxu0  ;;  %v472_v13 = vpop.f32.mrf.mxu1 }
 0x12e   :  { %3458 = vst [vmem:[#allocation22_spill] sm:$0xff] %v2990_v11  ;;  %v2992_v14 = vadd.f32 %v399_v12, %v150_v23  ;;  %v2995_v15 = vadd.f32 %v472_v13, %v2964_v19 }
 0x12f   :  { %v401_v16 = vpop.f32.mrf.mxu0  ;;  %v474_v20 = vpop.f32.mrf.mxu1 }
 0x130   :  { %3459 = vst [vmem:[#allocation23_spill] sm:$0xff] %v2992_v14  ;;  %3460 = vst [vmem:[#allocation24_spill] sm:$0xff] %v2995_v15  ;;  %v2997_v25 = vadd.f32 %v401_v16, %v154_v27  ;;  %v3000_v26 = vadd.f32 %v474_v20, %v2970_v24 }
 0x131   :  { %v405_v30 = vpop.f32.mrf.mxu0  ;;  %v478_v31 = vpop.f32.mrf.mxu1 }
 0x132   :  { %3461 = vst [vmem:[#allocation25_spill] sm:$0xff] %v2997_v25  ;;  %3462 = vst [vmem:[#allocation26_spill] sm:$0xff] %v3000_v26  ;;  %v3002_v44 = vadd.f32 %v405_v30, %v150_v23  ;;  %v3005_v53 = vadd.f32 %v478_v31, %v2964_v19 }
 0x133   :  { %v407_v2 = vpop.f32.mrf.mxu0  ;;  %v480_v9 = vpop.f32.mrf.mxu1 }
 0x134   :  { %3463 = vst [vmem:[#allocation27_spill] sm:$0xff] %v3002_v44  ;;  %3464 = vst [vmem:[#allocation28_spill] sm:$0xff] %v3005_v53  ;;  %v3007_v12 = vadd.f32 %v407_v2, %v154_v27  ;;  %v3010_v13 = vadd.f32 %v480_v9, %v2970_v24 }
 0x135   :  { %v409_v0 = vpop.f32.mrf.mxu0  ;;  %v482_v16 = vpop.f32.mrf.mxu1 }
 0x136   :  { %3465 = vst [vmem:[#allocation29_spill] sm:$0xff] %v3007_v12  ;;  %3466 = vst [vmem:[#allocation30_spill] sm:$0xff] %v3010_v13  ;;  %v3012_v15 = vadd.f32 %v409_v0, %v150_v23  ;;  %v3015_v20 = vadd.f32 %v482_v16, %v2964_v19 }
 0x137   :  { %v411_v26 = vpop.f32.mrf.mxu0  ;;  %v484_v30 = vpop.f32.mrf.mxu1 }
 0x138   :  { %3467 = vst [vmem:[#allocation31_spill] sm:$0xff] %v3012_v15  ;;  %3468 = vst [vmem:[#allocation32_spill] sm:$0xff] %v3015_v20  ;;  %v3017_v44 = vadd.f32 %v411_v26, %v154_v27  ;;  %v3020_v31 = vadd.f32 %v484_v30, %v2970_v24 }
 0x139   :  { %v415_v53 = vpop.f32.mrf.mxu0  ;;  %v488_v2 = vpop.f32.mrf.mxu1 }
 0x13a   :  { %3469 = vst [vmem:[#allocation33_spill] sm:$0xff] %v3017_v44  ;;  %3470 = vst [vmem:[#allocation34_spill] sm:$0xff] %v3020_v31  ;;  %v3022_v12 = vadd.f32 %v415_v53, %v150_v23  ;;  %v3025_v9 = vadd.f32 %v488_v2, %v2964_v19 }
 0x13b   :  { %v417_v13 = vpop.f32.mrf.mxu0  ;;  %v490_v0 = vpop.f32.mrf.mxu1 }
 0x13c   :  { %3471 = vst [vmem:[#allocation35_spill] sm:$0xff] %v3022_v12  ;;  %3472 = vst [vmem:[#allocation36_spill] sm:$0xff] %v3025_v9  ;;  %v3027_v15 = vadd.f32 %v417_v13, %v154_v27  ;;  %v3030_v16 = vadd.f32 %v490_v0, %v2970_v24  ;;  %v386_v12 = vadd.f32 %v2960_v17, %v150_v23 }
 0x13d   :  { %v419_v20 = vpop.f32.mrf.mxu0  ;;  %v492_v26 = vpop.f32.mrf.mxu1  ;;  %v388_v0 = vadd.f32 %v2966_v21, %v154_v27 }
 0x13e   :  { %3473 = vst [vmem:[#allocation37_spill] sm:$0xff] %v3027_v15  ;;  %3474 = vst [vmem:[#allocation38_spill] sm:$0xff] %v3030_v16  ;;  %v3032_v44 = vadd.f32 %v419_v20, %v150_v23  ;;  %v3035_v30 = vadd.f32 %v492_v26, %v2964_v19  ;;  %v461_v23 = vadd.f32 %v2968_v22, %v2970_v24 }
 0x13f   :  { %v421_v31 = vpop.f32.mrf.mxu0  ;;  %v494_v53 = vpop.f32.mrf.mxu1 }
 0x140   :  { %3475 = vst [vmem:[#allocation39_spill] sm:$0xff] %v3032_v44  ;;  %3476 = vst [vmem:[#allocation40_spill] sm:$0xff] %v3035_v30  ;;  %v3038_v2 = vadd.f32 %v421_v31, %v154_v27  ;;  %v3041_v9 = vadd.f32 %v494_v53, %v2970_v24  ;;  %v459_v53 = vadd.f32 %v2962_v18, %v2964_v19  ;;  %v3051_v18 = vpop.permute.xlu0 %839 }
 0x141   :  { %v760_v13 = vpop.f32.mrf.mxu0  ;;  %v801_v15 = vpop.f32.mrf.mxu1  ;;  %vm841_vm4 = vcmp.eq.s32.totalorder %v3051_v18, 1 }
 0x142   :  { %v808_v16 = vadd.f32 %v760_v13, %v386_v12  ;;  %v810_v12 = vadd.f32 %v801_v15, %v459_v53  ;;  %vm2133_vm5 = vmpackc.low %vm841_vm4, %vm841_vm4 }
 0x143   :  { %v762_v25 = vpop.f32.mrf.mxu0  ;;  %v803_v20 = vpop.f32.mrf.mxu1 }
 0x144   :  { %v2130_v44 = vmul.f32 -1.442695, %v808_v16  ;;  %v809_v14 = vadd.f32 %v762_v25, %v388_v0  ;;  %v811_v31 = vadd.f32 %v803_v20, %v461_v23 }
 0x145   :  { %v764_v26 = vpop.f32.mrf.mxu0  ;;  %v805_v30 = vpop.f32.mrf.mxu1 }
 0x146   :  { %2385 = vpow2.f32 %v2130_v44  ;;  %v2131_v60 = vmul.f32 -1.442695, %v809_v14  ;;  %v2132_v21 = vmul.f32 -1.442695, %v811_v31  ;;  %v3477_v31 = vmov 0  }
 0x147   :  { %v765_v11 = vpop.f32.mrf.mxu0  ;;  %v806_v17 = vpop.f32.mrf.mxu1  ;;  %v1090_v53 = vsel %vm1089_vm6, 1, %v3477_v31 }
 0x148   :  { %2387 = vpow2.f32 %v2131_v60  ;;  %1092 = vperm.xlu1 %2264, %v1090_v53  }
 0x149   :  { %2389 = vpow2.f32 %v2132_v21  ;;  %v1218_v21 = vsel %vm1217_vm7, 1, %v3477_v31 }
 0x14c   :  { %1220 = vperm.xlu1 %2264, %v1218_v21  }
 0x153   :  { %v2386_v27 = vpop.eup %2385 }
 0x154   :  { %v815_v13 = vadd.f32 1.0, %v2386_v27  ;;  %v1474_v27 = vsel %vm1473_vm8, 1, %v3477_v31 }
 0x155   :  { %v2388_v16 = vpop.eup %2387  ;;  %1476 = vperm.xlu1 %2264, %v1474_v27  }
 0x156   :  { %2391 = vrcp.f32 %v815_v13  ;;  %v821_v25 = vadd.f32 1.0, %v2388_v16  ;;  %v2390_v11 = vpop.eup %2389 }
 0x157   :  { %2393 = vtanh.f32 %v810_v12  ;;  %v828_v30 = vadd.f32 1.0, %v2390_v11  ;;  %v1730_v12 = vsel %vm1729_vm9, 1, %v3477_v31 }
 0x158   :  { %2395 = vrcp.f32 %v821_v25 }
 0x159   :  { %2397 = vrcp.f32 %v828_v30  ;;  %1732 = vperm.xlu1 %2264, %v1730_v12  }
 0x163   :  { %v2392_v14 = vpop.eup %2391 }
 0x164   :  { %v2394_v60 = vpop.eup %2393 }
 0x165   :  { %v2396_v44 = vpop.eup %2395  ;;  %v832_v24 = vmul.f32 %v2394_v60, %v2392_v14 }
 0x166   :  { %v831_v22 = vmul.f32 0.0, %v2396_v44  ;;  %v2398_v19 = vpop.eup %2397 }
 0x168   :  { %v3048_v0 = vadd.f32 %v832_v24, %v831_v22 }
 0x16a   :  { %2399 = vtanh.f32 %v3048_v0 }
 0x177   :  { %v2400_v15 = vpop.eup %2399 }
 0x178   :  { %v835_v20 = vmul.f32 %v2400_v15, %v2398_v19 }
 0x17a   :  { %v3059_v26 = vsel %vm841_vm4, %v835_v20, 0.0  ;;  %v2134_v17 = vpack.c.bf16 %v835_v20, %v835_v20 }
 0x17b   :  { %v844_v23 = vpack.c.bf16 %v3059_v26, %v3059_v26 }
 0x17c   :  { %2135 = vmatmul.mubr.msk.bf16.vlgmr.msra.gmra.mxu0 %vm2133_vm5, %v2134_v17  ;;  %2138 = vmatmul.mubr.msk.bf16.vlgmr.msra.gmra.mxu1 %vm2133_vm5, %v2134_v17 }
 0x17d   :  { %845 = vst [vmem:[#allocation3] sm:$0xf] %v844_v23  ;;  %980 = vmatpush1.bf16.msra.mxu0 %v2804_v36  ;;  %1021 = vmatpush1.bf16.msra.mxu1 %v2806_v37 }
 0x17e   :  { %981 = vmatprep.subr.bf16.mxu0 %v2810_v38  ;;  %1022 = vmatprep.subr.bf16.mxu1 %v2812_v39 }
 0x17f   :  { %1011 = vmatprep.mubr.bf16.mxu0 %v3477_v31  ;;  %1052 = vmatprep.mubr.bf16.mxu1 %v3477_v31 }
 0x181   :  { %982 = vmatpush1.bf16.msra.mxu0 %v2814_v40  ;;  %1023 = vmatpush1.bf16.msra.mxu1 %v2818_v41 }
 0x182   :  { %983 = vmatprep.subr.bf16.mxu0 %v2822_v42  ;;  %1024 = vmatprep.subr.bf16.mxu1 %v2824_v43 }
 0x185   :  { %984 = vmatpush1.bf16.msra.mxu0 %v2828_v45  ;;  %1025 = vmatpush1.bf16.msra.mxu1 %v2830_v46 }
 0x186   :  { %985 = vmatprep.subr.bf16.mxu0 %v2834_v47  ;;  %1026 = vmatprep.subr.bf16.mxu1 %v2838_v48 }
 0x189   :  { %986 = vmatpush1.bf16.msra.mxu0 %v2840_v49  ;;  %1027 = vmatpush1.bf16.msra.mxu1 %v2842_v50 }
 0x18a   :  { %987 = vmatprep.subr.bf16.mxu0 %v2846_v51  ;;  %1028 = vmatprep.subr.bf16.mxu1 %v2850_v52 }
 0x18d   :  { %988 = vmatpush1.bf16.msra.mxu0 %v2854_v54  ;;  %1029 = vmatpush1.bf16.msra.mxu1 %v2861_v56 }
 0x18e   :  { %989 = vmatprep.subr.bf16.mxu0 %v2863_v57  ;;  %1030 = vmatprep.subr.bf16.mxu1 %v2869_v58 }
 0x191   :  { %990 = vmatpush1.bf16.msra.mxu0 %v2876_v61  ;;  %1031 = vmatpush1.bf16.msra.mxu1 %v2878_v62 }
 0x192   :  { %991 = vmatprep.subr.bf16.mxu0 %v2880_v63  ;;  %1032 = vmatprep.subr.bf16.mxu1 %v2882_v1 }
 0x195   :  { %992 = vmatpush1.bf16.msra.mxu0 %v2890_v3  ;;  %1033 = vmatpush1.bf16.msra.mxu1 %v2892_v4 }
 0x196   :  { %993 = vmatprep.subr.bf16.mxu0 %v2894_v5  ;;  %1034 = vmatprep.subr.bf16.mxu1 %v2896_v6 }
 0x199   :  { %994 = vmatpush1.bf16.msra.mxu0 %v2904_v7  ;;  %1035 = vmatpush1.bf16.msra.mxu1 %v2906_v8 }
 0x19a   :  { %1107 = vmatprep.subr.bf16.mxu0 %v2800_v33  ;;  %1148 = vmatprep.subr.bf16.mxu1 %v2802_v34 }
 0x23c   :  { %v885_v13 = vpop.f32.mrf.mxu0  ;;  %v926_v16 = vpop.f32.mrf.mxu1 }
 0x23d   :  { %v933_v25 = vadd.f32 %v885_v13, %v2972_v28  ;;  %v935_v20 = vadd.f32 %v926_v16, %v2975_v29  ;;  %v965_v16 = vpop.permute.xlu0 %964 }
 0x23e   :  { %v887_v11 = vpop.f32.mrf.mxu0  ;;  %v928_v14 = vpop.f32.mrf.mxu1  ;;  %vm966_vm10 = vcmp.eq.s32.totalorder %v965_v16, 1 }
 0x23f   :  { %v2139_v60 = vmul.f32 -1.442695, %v933_v25  ;;  %v934_v44 = vadd.f32 %v887_v11, %v2977_v32  ;;  %v936_v55 = vadd.f32 %v928_v14, %v2980_v35  ;;  %v843_v35 = vsel %vm841_vm4, %v3048_v0, 0.0 }
 0x240   :  { %v889_v30 = vpop.f32.mrf.mxu0  ;;  %v930_v22 = vpop.f32.mrf.mxu1 }
 0x241   :  { %2401 = vpow2.f32 %v2139_v60  ;;  %v2140_v24 = vmul.f32 -1.442695, %v934_v44  ;;  %v2141_v17 = vmul.f32 -1.442695, %v936_v55 }
 0x242   :  { %v890_v19 = vpop.f32.mrf.mxu0  ;;  %v931_v15 = vpop.f32.mrf.mxu1 }
 0x243   :  { %2403 = vpow2.f32 %v2140_v24 }
 0x244   :  { %2405 = vtanh.f32 %v935_v20 }
 0x245   :  { %2407 = vpow2.f32 %v2141_v17 }
 0x24e   :  { %v2402_v23 = vpop.eup %2401 }
 0x24f   :  { %v940_v53 = vadd.f32 1.0, %v2402_v23 }
 0x250   :  { %v2404_v28 = vpop.eup %2403 }
 0x251   :  { %2409 = vrcp.f32 %v940_v53  ;;  %v946_v21 = vadd.f32 1.0, %v2404_v28  ;;  %v2406_v32 = vpop.eup %2405 }
 0x252   :  { %v2408_v27 = vpop.eup %2407 }
 0x253   :  { %2411 = vrcp.f32 %v946_v21  ;;  %v953_v11 = vadd.f32 1.0, %v2408_v27 }
 0x255   :  { %2413 = vrcp.f32 %v953_v11 }
 0x25e   :  { %v2410_v12 = vpop.eup %2409 }
 0x25f   :  { %v957_v13 = vmul.f32 %v2410_v12, %v2406_v32 }
 0x260   :  { %v2412_v25 = vpop.eup %2411 }
 0x261   :  { %v956_v29 = vmul.f32 %v2412_v25, %v843_v35  ;;  %v3479_v25 = vld [vmem:[#allocation21_spill] sm:$0xff] }
 0x262   :  { %v2414_v44 = vpop.eup %2413 }
 0x263   :  { %v958_v14 = vadd.f32 %v957_v13, %v956_v29  ;;  %v3478_v13 = vld [vmem:[#allocation22_spill] sm:$0xff] }
 0x265   :  { %2415 = vtanh.f32 %v958_v14  ;;  %v3112_v60 = vsel %vm966_vm10, %v958_v14, %v843_v35 }
 0x272   :  { %v2416_v30 = vpop.eup %2415 }
 0x273   :  { %v960_v22 = vmul.f32 %v2416_v30, %v2414_v44  ;;  %v1093_v30 = vpop.permute.xlu1 %1092 }
 0x274   :  { %vm1094_vm11 = vcmp.eq.s32.totalorder %v1093_v30, 1 }
 0x275   :  { %v3115_v24 = vsel %vm966_vm10, %v960_v22, %v3059_v26  ;;  %v969_v19 = vsel %vm966_vm10, %v960_v22, 0.0 }
 0x276   :  { %v970_v15 = vpack.c.bf16 %v969_v19, %v969_v19  ;;  %v978_v0 = vpack.c.bf16 %v3115_v24, %v3115_v24 }
 0x278   :  { %972 = vst [vmem:[#allocation3 + $0x4] sm:$0xf] %v970_v15  ;;  %1012 = vmatmul.mubr.bf16.vlgmr.msra.gmra.mxu0 %v978_v0  ;;  %1053 = vmatmul.mubr.bf16.vlgmr.msra.gmra.mxu1 %v978_v0 }
 0x279   :  { %1108 = vmatpush1.bf16.msra.mxu0 %v2804_v36  ;;  %1149 = vmatpush1.bf16.msra.mxu1 %v2806_v37 }
 0x27a   :  { %1109 = vmatprep.subr.bf16.mxu0 %v2810_v38  ;;  %1150 = vmatprep.subr.bf16.mxu1 %v2812_v39 }
 0x27b   :  { %1139 = vmatprep.mubr.bf16.mxu0 %v3477_v31  ;;  %1180 = vmatprep.mubr.bf16.mxu1 %v3477_v31 }
 0x27d   :  { %1110 = vmatpush1.bf16.msra.mxu0 %v2814_v40  ;;  %1151 = vmatpush1.bf16.msra.mxu1 %v2818_v41 }
 0x27e   :  { %1111 = vmatprep.subr.bf16.mxu0 %v2822_v42  ;;  %1152 = vmatprep.subr.bf16.mxu1 %v2824_v43 }
 0x281   :  { %1112 = vmatpush1.bf16.msra.mxu0 %v2828_v45  ;;  %1153 = vmatpush1.bf16.msra.mxu1 %v2830_v46 }
 0x282   :  { %1113 = vmatprep.subr.bf16.mxu0 %v2834_v47  ;;  %1154 = vmatprep.subr.bf16.mxu1 %v2838_v48 }
 0x285   :  { %1114 = vmatpush1.bf16.msra.mxu0 %v2840_v49  ;;  %1155 = vmatpush1.bf16.msra.mxu1 %v2842_v50 }
 0x286   :  { %1115 = vmatprep.subr.bf16.mxu0 %v2846_v51  ;;  %1156 = vmatprep.subr.bf16.mxu1 %v2850_v52 }
 0x289   :  { %1116 = vmatpush1.bf16.msra.mxu0 %v2854_v54  ;;  %1157 = vmatpush1.bf16.msra.mxu1 %v2861_v56 }
 0x28a   :  { %1117 = vmatprep.subr.bf16.mxu0 %v2863_v57  ;;  %1158 = vmatprep.subr.bf16.mxu1 %v2869_v58 }
 0x28d   :  { %1118 = vmatpush1.bf16.msra.mxu0 %v2876_v61  ;;  %1159 = vmatpush1.bf16.msra.mxu1 %v2878_v62 }
 0x28e   :  { %1119 = vmatprep.subr.bf16.mxu0 %v2880_v63  ;;  %1160 = vmatprep.subr.bf16.mxu1 %v2882_v1 }
 0x291   :  { %1120 = vmatpush1.bf16.msra.mxu0 %v2890_v3  ;;  %1161 = vmatpush1.bf16.msra.mxu1 %v2892_v4 }
 0x292   :  { %1121 = vmatprep.subr.bf16.mxu0 %v2894_v5  ;;  %1162 = vmatprep.subr.bf16.mxu1 %v2896_v6 }
 0x295   :  { %1122 = vmatpush1.bf16.msra.mxu0 %v2904_v7  ;;  %1163 = vmatpush1.bf16.msra.mxu1 %v2906_v8 }
 0x296   :  { %1235 = vmatprep.subr.bf16.mxu0 %v2800_v33  ;;  %1276 = vmatprep.subr.bf16.mxu1 %v2802_v34 }
 0x338   :  { %v1013_v18 = vpop.f32.mrf.mxu0  ;;  %v1054_v26 = vpop.f32.mrf.mxu1 }
 0x339   :  { %v1061_v55 = vadd.f32 %v1013_v18, %v2982_v59  ;;  %v1063_v34 = vadd.f32 %v1054_v26, %v3479_v25 }
 0x33a   :  { %v1015_v20 = vpop.f32.mrf.mxu0  ;;  %v1056_v17 = vpop.f32.mrf.mxu1 }
 0x33b   :  { %v2142_v23 = vmul.f32 -1.442695, %v1061_v55  ;;  %v1062_v53 = vadd.f32 %v1015_v20, %v2987_v10  ;;  %v1064_v33 = vadd.f32 %v1056_v17, %v3478_v13 }
 0x33c   :  { %v1017_v28 = vpop.f32.mrf.mxu0  ;;  %v1058_v21 = vpop.f32.mrf.mxu1 }
 0x33d   :  { %2417 = vpow2.f32 %v2142_v23  ;;  %v2143_v32 = vmul.f32 -1.442695, %v1062_v53  ;;  %v2144_v35 = vmul.f32 -1.442695, %v1064_v33 }
 0x33e   :  { %v1018_v27 = vpop.f32.mrf.mxu0  ;;  %v1059_v12 = vpop.f32.mrf.mxu1 }
 0x33f   :  { %2419 = vpow2.f32 %v2143_v32 }
 0x340   :  { %2421 = vtanh.f32 %v1063_v34 }
 0x341   :  { %2423 = vpow2.f32 %v2144_v35 }
 0x34a   :  { %v2418_v11 = vpop.eup %2417 }
 0x34b   :  { %v1068_v29 = vadd.f32 1.0, %v2418_v11  ;;  %v1221_v11 = vpop.permute.xlu1 %1220 }
 0x34c   :  { %v2420_v59 = vpop.eup %2419  ;;  %vm1222_vm12 = vcmp.eq.s32.totalorder %v1221_v11, 1 }
 0x34d   :  { %2425 = vrcp.f32 %v1068_v29  ;;  %v1074_v16 = vadd.f32 1.0, %v2420_v59  ;;  %v2422_v10 = vpop.eup %2421 }
 0x34e   :  { %v2424_v14 = vpop.eup %2423 }
 0x34f   :  { %2427 = vrcp.f32 %v1074_v16  ;;  %v1081_v15 = vadd.f32 1.0, %v2424_v14 }
 0x351   :  { %2429 = vrcp.f32 %v1081_v15  ;;  %v3217_v15 = vld [vmem:[#allocation9 + $0xe0] ss:$16 sps:$4 sm:$0xff]  }
 0x35a   :  { %v2426_v44 = vpop.eup %2425 }
 0x35b   :  { %v1085_v22 = vmul.f32 %v2426_v44, %v2422_v10 }
 0x35c   :  { %v2428_v19 = vpop.eup %2427 }
 0x35d   :  { %v1084_v0 = vmul.f32 %v2428_v19, %v3112_v60 }
 0x35e   :  { %v2430_v55 = vpop.eup %2429 }
 0x35f   :  { %v1086_v18 = vadd.f32 %v1085_v22, %v1084_v0  ;;  %v3220_v0 = vld [vmem:[#allocation9 + $0xe8] ss:$16 sps:$4 sm:$0xff]  }
 0x361   :  { %2431 = vtanh.f32 %v1086_v18  ;;  %v3159_v26 = vsel %vm1094_vm11, %v1086_v18, %v3112_v60  ;;  %v3223_v18 = vld [vmem:[#allocation9 + $0xc4] ss:$16 sps:$4 sm:$0xff]  }
 0x36e   :  { %v2432_v20 = vpop.eup %2431 }
 0x36f   :  { %v1088_v17 = vmul.f32 %v2432_v20, %v2430_v55  ;;  %v3231_v55 = vld [vmem:[#allocation9 + $0xc0] ss:$16 sps:$4 sm:$0xff]   ;;  %v3234_v20 = vld [vmem:[#allocation9 + $0xc8] ss:$16 sps:$4 sm:$0xff]  }
 0x371   :  { %v3162_v23 = vsel %vm1094_vm11, %v1088_v17, %v3115_v24  ;;  %v1097_v53 = vsel %vm1094_vm11, %v1088_v17, 0.0  ;;  %v3237_v17 = vld [vmem:[#allocation9 + $0xa4] ss:$16 sps:$4 sm:$0xff]  }
 0x372   :  { %v1098_v28 = vpack.c.bf16 %v1097_v53, %v1097_v53  ;;  %v1106_v21 = vpack.c.bf16 %v3162_v23, %v3162_v23  ;;  %v3243_v53 = vld [vmem:[#allocation9 + $0xa0] ss:$16 sps:$4 sm:$0xff]  }
 0x374   :  { %1100 = vst [vmem:[#allocation3 + $0x8] sm:$0xf] %v1098_v28  ;;  %1140 = vmatmul.mubr.bf16.vlgmr.msra.gmra.mxu0 %v1106_v21  ;;  %1181 = vmatmul.mubr.bf16.vlgmr.msra.gmra.mxu1 %v1106_v21  ;;  %v3246_v28 = vld [vmem:[#allocation9 + $0xa8] ss:$16 sps:$4 sm:$0xff]   ;;  %v3249_v21 = vld [vmem:[#allocation9 + $0x84] ss:$16 sps:$4 sm:$0xff]  }
 0x375   :  { %1236 = vmatpush1.bf16.msra.mxu0 %v2804_v36  ;;  %1277 = vmatpush1.bf16.msra.mxu1 %v2806_v37  ;;  %v3198_v36 = vld [vmem:[#allocation9 + $0xe4] ss:$16 sps:$4 sm:$0xff]   ;;  %v3201_v37 = vld [vmem:[#allocation9 + $0xec] ss:$16 sps:$4 sm:$0xff]  }
 0x376   :  { %1237 = vmatprep.subr.bf16.mxu0 %v2810_v38  ;;  %1278 = vmatprep.subr.bf16.mxu1 %v2812_v39 }
 0x377   :  { %1267 = vmatprep.mubr.bf16.mxu0 %v3477_v31  ;;  %1308 = vmatprep.mubr.bf16.mxu1 %v3477_v31 }
 0x379   :  { %1238 = vmatpush1.bf16.msra.mxu0 %v2814_v40  ;;  %1279 = vmatpush1.bf16.msra.mxu1 %v2818_v41  ;;  %v3480_v40 = vld [vmem:[#allocation23_spill] sm:$0xff] }
 0x37a   :  { %1239 = vmatprep.subr.bf16.mxu0 %v2822_v42  ;;  %1280 = vmatprep.subr.bf16.mxu1 %v2824_v43 }
 0x37d   :  { %1240 = vmatpush1.bf16.msra.mxu0 %v2828_v45  ;;  %1281 = vmatpush1.bf16.msra.mxu1 %v2830_v46  ;;  %v3481_v46 = vld [vmem:[#allocation25_spill] sm:$0xff] }
 0x37e   :  { %1241 = vmatprep.subr.bf16.mxu0 %v2834_v47  ;;  %1282 = vmatprep.subr.bf16.mxu1 %v2838_v48 }
 0x381   :  { %1242 = vmatpush1.bf16.msra.mxu0 %v2840_v49  ;;  %1283 = vmatpush1.bf16.msra.mxu1 %v2842_v50 }
 0x382   :  { %1243 = vmatprep.subr.bf16.mxu0 %v2846_v51  ;;  %1284 = vmatprep.subr.bf16.mxu1 %v2850_v52 }
 0x385   :  { %1244 = vmatpush1.bf16.msra.mxu0 %v2854_v54  ;;  %1285 = vmatpush1.bf16.msra.mxu1 %v2861_v56  ;;  %v3482_v54 = vld [vmem:[#allocation26_spill] sm:$0xff] }
 0x386   :  { %1245 = vmatprep.subr.bf16.mxu0 %v2863_v57  ;;  %1286 = vmatprep.subr.bf16.mxu1 %v2869_v58  ;;  %v3483_v57 = vld [vmem:[#allocation24_spill] sm:$0xff] }
 0x389   :  { %1246 = vmatpush1.bf16.msra.mxu0 %v2876_v61  ;;  %1287 = vmatpush1.bf16.msra.mxu1 %v2878_v62 }
 0x38a   :  { %1247 = vmatprep.subr.bf16.mxu0 %v2880_v63  ;;  %1288 = vmatprep.subr.bf16.mxu1 %v2882_v1 }
 0x38d   :  { %1248 = vmatpush1.bf16.msra.mxu0 %v2890_v3  ;;  %1289 = vmatpush1.bf16.msra.mxu1 %v2892_v4 }
 0x38e   :  { %1249 = vmatprep.subr.bf16.mxu0 %v2894_v5  ;;  %1290 = vmatprep.subr.bf16.mxu1 %v2896_v6 }
 0x391   :  { %1250 = vmatpush1.bf16.msra.mxu0 %v2904_v7  ;;  %1291 = vmatpush1.bf16.msra.mxu1 %v2906_v8 }
 0x392   :  { %1363 = vmatprep.subr.bf16.mxu0 %v3198_v36  ;;  %1404 = vmatprep.subr.bf16.mxu1 %v3201_v37 }
 0x434   :  { %v1141_v38 = vpop.f32.mrf.mxu0  ;;  %v1182_v39 = vpop.f32.mrf.mxu1 }
 0x435   :  { %v1189_v41 = vadd.f32 %v1141_v38, %v3480_v40  ;;  %v1191_v58 = vadd.f32 %v1182_v39, %v3483_v57  ;;  %v3252_v38 = vld [vmem:[#allocation9 + $0x8c] ss:$16 sps:$4 sm:$0xff]   ;;  %v3255_v39 = vld [vmem:[#allocation9 + $0x80] ss:$16 sps:$4 sm:$0xff]   ;;  %v3258_v40 = vld [vmem:[#allocation9 + $0x88] ss:$16 sps:$4 sm:$0xff]  }
 0x436   :  { %v1143_v42 = vpop.f32.mrf.mxu0  ;;  %v1184_v43 = vpop.f32.mrf.mxu1 }
 0x437   :  { %v2145_v45 = vmul.f32 -1.442695, %v1189_v41  ;;  %v1190_v47 = vadd.f32 %v1143_v42, %v3481_v46  ;;  %v1192_v56 = vadd.f32 %v1184_v43, %v3482_v54  ;;  %v3261_v41 = vld [vmem:[#allocation9 + $0x64] ss:$16 sps:$4 sm:$0xff]   ;;  %v3264_v42 = vld [vmem:[#allocation9 + $0x6c] ss:$16 sps:$4 sm:$0xff]  }
 0x438   :  { %v1145_v48 = vpop.f32.mrf.mxu0  ;;  %v1186_v49 = vpop.f32.mrf.mxu1  ;;  %v3267_v43 = vld [vmem:[#allocation9 + $0x60] ss:$16 sps:$4 sm:$0xff]   ;;  %v3273_v46 = vld [vmem:[#allocation9 + $0x44] ss:$16 sps:$4 sm:$0xff]  }
 0x439   :  { %2433 = vpow2.f32 %v2145_v45  ;;  %v2146_v50 = vmul.f32 -1.442695, %v1190_v47  ;;  %v2147_v61 = vmul.f32 -1.442695, %v1192_v56  ;;  %v3270_v45 = vld [vmem:[#allocation9 + $0x68] ss:$16 sps:$4 sm:$0xff]  }
 0x43a   :  { %v1146_v51 = vpop.f32.mrf.mxu0  ;;  %v1187_v52 = vpop.f32.mrf.mxu1  ;;  %v3276_v47 = vld [vmem:[#allocation9 + $0x4c] ss:$16 sps:$4 sm:$0xff]   ;;  %v3279_v48 = vld [vmem:[#allocation9 + $0x40] ss:$16 sps:$4 sm:$0xff]   ;;  %v3282_v49 = vld [vmem:[#allocation9 + $0x48] ss:$16 sps:$4 sm:$0xff]  }
 0x43b   :  { %2435 = vpow2.f32 %v2146_v50  ;;  %v3484_v51 = vld [vmem:[#allocation27_spill] sm:$0xff] }
 0x43c   :  { %2437 = vtanh.f32 %v1191_v58 }
 0x43d   :  { %2439 = vpow2.f32 %v2147_v61 }
 0x446   :  { %v2434_v62 = vpop.eup %2433 }
 0x447   :  { %v1196_v60 = vadd.f32 1.0, %v2434_v62  ;;  %v3487_v62 = vld [vmem:[#allocation28_spill] sm:$0xff] }
 0x448   :  { %v2436_v24 = vpop.eup %2435 }
 0x449   :  { %2441 = vrcp.f32 %v1196_v60  ;;  %v1202_v32 = vadd.f32 1.0, %v2436_v24  ;;  %v2438_v27 = vpop.eup %2437 }
 0x44a   :  { %v2440_v12 = vpop.eup %2439 }
 0x44b   :  { %2443 = vrcp.f32 %v1202_v32  ;;  %v1209_v34 = vadd.f32 1.0, %v2440_v12 }
 0x44d   :  { %2445 = vrcp.f32 %v1209_v34 }
 0x456   :  { %v2442_v13 = vpop.eup %2441 }
 0x457   :  { %v1213_v33 = vmul.f32 %v2442_v13, %v2438_v27 }
 0x458   :  { %v2444_v25 = vpop.eup %2443 }
 0x459   :  { %v1212_v35 = vmul.f32 %v2444_v25, %v3159_v26 }
 0x45a   :  { %v2446_v16 = vpop.eup %2445 }
 0x45b   :  { %v1214_v29 = vadd.f32 %v1213_v33, %v1212_v35 }
 0x45d   :  { %2447 = vtanh.f32 %v1214_v29  ;;  %v3210_v59 = vsel %vm1222_vm12, %v1214_v29, %v3159_v26  ;;  %v3226_v26 = vld [vmem:[#allocation9 + $0xcc] ss:$16 sps:$4 sm:$0xff]  }
 0x46a   :  { %v2448_v10 = vpop.eup %2447 }
 0x46b   :  { %v1216_v14 = vmul.f32 %v2448_v10, %v2446_v16  ;;  %v1349_v10 = vpop.permute.xlu0 %1348 }
 0x46c   :  { %vm1350_vm13 = vcmp.eq.s32.totalorder %v1349_v10, 1 }
 0x46d   :  { %v3213_v44 = vsel %vm1222_vm12, %v1216_v14, %v3162_v23  ;;  %v1225_v30 = vsel %vm1222_vm12, %v1216_v14, 0.0  ;;  %v3240_v23 = vld [vmem:[#allocation9 + $0xac] ss:$16 sps:$4 sm:$0xff]  }
 0x46e   :  { %v1226_v22 = vpack.c.bf16 %v1225_v30, %v1225_v30  ;;  %v1234_v19 = vpack.c.bf16 %v3213_v44, %v3213_v44 }
 0x470   :  { %1228 = vst [vmem:[#allocation3 + $0xc] sm:$0xf] %v1226_v22  ;;  %1268 = vmatmul.mubr.bf16.vlgmr.msra.gmra.mxu0 %v1234_v19  ;;  %1309 = vmatmul.mubr.bf16.vlgmr.msra.gmra.mxu1 %v1234_v19 }
 0x471   :  { %1364 = vmatpush1.bf16.msra.mxu0 %v3217_v15  ;;  %1405 = vmatpush1.bf16.msra.mxu1 %v3220_v0 }
 0x472   :  { %1365 = vmatprep.subr.bf16.mxu0 %v3223_v18  ;;  %1406 = vmatprep.subr.bf16.mxu1 %v3226_v26 }
 0x473   :  { %1395 = vmatprep.mubr.bf16.mxu0 %v3477_v31  ;;  %1436 = vmatprep.mubr.bf16.mxu1 %v3477_v31 }
 0x475   :  { %1366 = vmatpush1.bf16.msra.mxu0 %v3231_v55  ;;  %1407 = vmatpush1.bf16.msra.mxu1 %v3234_v20 }
 0x476   :  { %1367 = vmatprep.subr.bf16.mxu0 %v3237_v17  ;;  %1408 = vmatprep.subr.bf16.mxu1 %v3240_v23 }
 0x479   :  { %1368 = vmatpush1.bf16.msra.mxu0 %v3243_v53  ;;  %1409 = vmatpush1.bf16.msra.mxu1 %v3246_v28 }
 0x47a   :  { %1369 = vmatprep.subr.bf16.mxu0 %v3249_v21  ;;  %1410 = vmatprep.subr.bf16.mxu1 %v3252_v38 }
 0x47d   :  { %1370 = vmatpush1.bf16.msra.mxu0 %v3255_v39  ;;  %1411 = vmatpush1.bf16.msra.mxu1 %v3258_v40 }
 0x47e   :  { %1371 = vmatprep.subr.bf16.mxu0 %v3261_v41  ;;  %1412 = vmatprep.subr.bf16.mxu1 %v3264_v42 }
 0x481   :  { %1372 = vmatpush1.bf16.msra.mxu0 %v3267_v43  ;;  %1413 = vmatpush1.bf16.msra.mxu1 %v3270_v45 }
 0x482   :  { %1373 = vmatprep.subr.bf16.mxu0 %v3273_v46  ;;  %1414 = vmatprep.subr.bf16.mxu1 %v3276_v47 }
 0x485   :  { %1374 = vmatpush1.bf16.msra.mxu0 %v3279_v48  ;;  %1415 = vmatpush1.bf16.msra.mxu1 %v3282_v49 }
 0x486   :  { %1375 = vmatprep.subr.bf16.mxu0 %v2880_v63  ;;  %1416 = vmatprep.subr.bf16.mxu1 %v2882_v1 }
 0x489   :  { %1376 = vmatpush1.bf16.msra.mxu0 %v2890_v3  ;;  %1417 = vmatpush1.bf16.msra.mxu1 %v2892_v4  ;;  %v3485_v4 = vld [vmem:[#allocation29_spill] sm:$0xff] }
 0x48a   :  { %1377 = vmatprep.subr.bf16.mxu0 %v2894_v5  ;;  %1418 = vmatprep.subr.bf16.mxu1 %v2896_v6 }
 0x48d   :  { %1378 = vmatpush1.bf16.msra.mxu0 %v2904_v7  ;;  %1419 = vmatpush1.bf16.msra.mxu1 %v2906_v8  ;;  %v3486_v8 = vld [vmem:[#allocation30_spill] sm:$0xff] }
 0x48e   :  { %1491 = vmatprep.subr.bf16.mxu0 %v3198_v36  ;;  %1532 = vmatprep.subr.bf16.mxu1 %v3201_v37 }
 0x530   :  { %v1269_v50 = vpop.f32.mrf.mxu0  ;;  %v1310_v63 = vpop.f32.mrf.mxu1 }
 0x531   :  { %v1317_v1 = vadd.f32 %v1269_v50, %v3484_v51  ;;  %v1319_v60 = vadd.f32 %v1310_v63, %v3487_v62 }
 0x532   :  { %v1271_v52 = vpop.f32.mrf.mxu0  ;;  %v1312_v3 = vpop.f32.mrf.mxu1 }
 0x533   :  { %v2148_v54 = vmul.f32 -1.442695, %v1317_v1  ;;  %v1318_v56 = vadd.f32 %v1271_v52, %v3485_v4  ;;  %v1320_v61 = vadd.f32 %v1312_v3, %v3486_v8  ;;  %v3338_v3 = vld [vmem:[#allocation9 + $0x20] ss:$16 sps:$4 sm:$0xff]   ;;  %v3344_v4 = vld [vmem:[#allocation9 + $0x4] ss:$16 sps:$4 sm:$0xff]  }
 0x534   :  { %v1273_v5 = vpop.f32.mrf.mxu0  ;;  %v1314_v57 = vpop.f32.mrf.mxu1 }
 0x535   :  { %2449 = vpow2.f32 %v2148_v54  ;;  %v2149_v6 = vmul.f32 -1.442695, %v1318_v56  ;;  %v2150_v24 = vmul.f32 -1.442695, %v1320_v61  ;;  %v3341_v54 = vld [vmem:[#allocation9 + $0x28] ss:$16 sps:$4 sm:$0xff]  }
 0x536   :  { %v1274_v7 = vpop.f32.mrf.mxu0  ;;  %v1315_v58 = vpop.f32.mrf.mxu1  ;;  %v3347_v56 = vld [vmem:[#allocation9 + $0xc] ss:$16 sps:$4 sm:$0xff]   ;;  %v3350_v5 = vld [vmem:[#allocation9] ss:$16 sps:$4 sm:$0xff]   ;;  %v3353_v57 = vld [vmem:[#allocation9 + $0x8] ss:$16 sps:$4 sm:$0xff]  }
 0x537   :  { %2451 = vpow2.f32 %v2149_v6  ;;  %v3488_v58 = vld [vmem:[#allocation31_spill] sm:$0xff] }
 0x538   :  { %2453 = vtanh.f32 %v1319_v60 }
 0x539   :  { %2455 = vpow2.f32 %v2150_v24  ;;  %v3489_v24 = vld [vmem:[#allocation33_spill] sm:$0xff] }
 0x542   :  { %v2450_v32 = vpop.eup %2449 }
 0x543   :  { %v1324_v27 = vadd.f32 1.0, %v2450_v32 }
 0x544   :  { %v2452_v12 = vpop.eup %2451 }
 0x545   :  { %2457 = vrcp.f32 %v1324_v27  ;;  %v1330_v13 = vadd.f32 1.0, %v2452_v12  ;;  %v2454_v33 = vpop.eup %2453 }
 0x546   :  { %v2456_v25 = vpop.eup %2455 }
 0x547   :  { %2459 = vrcp.f32 %v1330_v13  ;;  %v1337_v29 = vadd.f32 1.0, %v2456_v25 }
 0x549   :  { %2461 = vrcp.f32 %v1337_v29 }
 0x552   :  { %v2458_v34 = vpop.eup %2457 }
 0x553   :  { %v1341_v35 = vmul.f32 %v2458_v34, %v2454_v33  ;;  %v3490_v34 = vld [vmem:[#allocation34_spill] sm:$0xff] }
 0x554   :  { %v2460_v11 = vpop.eup %2459 }
 0x555   :  { %v1340_v16 = vmul.f32 %v2460_v11, %v3210_v59 }
 0x556   :  { %v2462_v22 = vpop.eup %2461 }
 0x557   :  { %v1342_v14 = vadd.f32 %v1341_v35, %v1340_v16  ;;  %v3491_v35 = vld [vmem:[#allocation32_spill] sm:$0xff] }
 0x559   :  { %2463 = vtanh.f32 %v1342_v14  ;;  %v3301_v30 = vsel %vm1350_vm13, %v1342_v14, %v3210_v59  ;;  %v3332_v59 = vld [vmem:[#allocation9 + $0x24] ss:$16 sps:$4 sm:$0xff]  }
 0x566   :  { %v2464_v19 = vpop.eup %2463 }
 0x567   :  { %v1344_v50 = vmul.f32 %v2464_v19, %v2462_v22 }
 0x569   :  { %v3304_v63 = vsel %vm1350_vm13, %v1344_v50, %v3213_v44  ;;  %v1353_v51 = vsel %vm1350_vm13, %v1344_v50, 0.0  ;;  %v3335_v44 = vld [vmem:[#allocation9 + $0x2c] ss:$16 sps:$4 sm:$0xff]  }
 0x56a   :  { %v1354_v1 = vpack.c.bf16 %v1353_v51, %v1353_v51  ;;  %v1362_v52 = vpack.c.bf16 %v3304_v63, %v3304_v63 }
 0x56c   :  { %1356 = vst [vmem:[#allocation3 + $0x10] sm:$0xf] %v1354_v1  ;;  %1396 = vmatmul.mubr.bf16.vlgmr.msra.gmra.mxu0 %v1362_v52  ;;  %1437 = vmatmul.mubr.bf16.vlgmr.msra.gmra.mxu1 %v1362_v52 }
 0x56d   :  { %1492 = vmatpush1.bf16.msra.mxu0 %v3217_v15  ;;  %1533 = vmatpush1.bf16.msra.mxu1 %v3220_v0 }
 0x56e   :  { %1493 = vmatprep.subr.bf16.mxu0 %v3223_v18  ;;  %1534 = vmatprep.subr.bf16.mxu1 %v3226_v26 }
 0x56f   :  { %1523 = vmatprep.mubr.bf16.mxu0 %v3477_v31  ;;  %1564 = vmatprep.mubr.bf16.mxu1 %v3477_v31 }
 0x571   :  { %1494 = vmatpush1.bf16.msra.mxu0 %v3231_v55  ;;  %1535 = vmatpush1.bf16.msra.mxu1 %v3234_v20 }
 0x572   :  { %1495 = vmatprep.subr.bf16.mxu0 %v3237_v17  ;;  %1536 = vmatprep.subr.bf16.mxu1 %v3240_v23 }
 0x575   :  { %1496 = vmatpush1.bf16.msra.mxu0 %v3243_v53  ;;  %1537 = vmatpush1.bf16.msra.mxu1 %v3246_v28 }
 0x576   :  { %1497 = vmatprep.subr.bf16.mxu0 %v3249_v21  ;;  %1538 = vmatprep.subr.bf16.mxu1 %v3252_v38 }
 0x579   :  { %1498 = vmatpush1.bf16.msra.mxu0 %v3255_v39  ;;  %1539 = vmatpush1.bf16.msra.mxu1 %v3258_v40 }
 0x57a   :  { %1499 = vmatprep.subr.bf16.mxu0 %v3261_v41  ;;  %1540 = vmatprep.subr.bf16.mxu1 %v3264_v42 }
 0x57d   :  { %1500 = vmatpush1.bf16.msra.mxu0 %v3267_v43  ;;  %1541 = vmatpush1.bf16.msra.mxu1 %v3270_v45 }
 0x57e   :  { %1501 = vmatprep.subr.bf16.mxu0 %v3273_v46  ;;  %1542 = vmatprep.subr.bf16.mxu1 %v3276_v47 }
 0x581   :  { %1502 = vmatpush1.bf16.msra.mxu0 %v3279_v48  ;;  %1543 = vmatpush1.bf16.msra.mxu1 %v3282_v49 }
 0x582   :  { %1503 = vmatprep.subr.bf16.mxu0 %v3332_v59  ;;  %1544 = vmatprep.subr.bf16.mxu1 %v3335_v44 }
 0x585   :  { %1504 = vmatpush1.bf16.msra.mxu0 %v3338_v3  ;;  %1545 = vmatpush1.bf16.msra.mxu1 %v3341_v54 }
 0x586   :  { %1505 = vmatprep.subr.bf16.mxu0 %v3344_v4  ;;  %1546 = vmatprep.subr.bf16.mxu1 %v3347_v56 }
 0x589   :  { %1506 = vmatpush1.bf16.msra.mxu0 %v3350_v5  ;;  %1547 = vmatpush1.bf16.msra.mxu1 %v3353_v57 }
 0x58a   :  { %1619 = vmatprep.subr.bf16.mxu0 %v3198_v36  ;;  %1660 = vmatprep.subr.bf16.mxu1 %v3201_v37 }
 0x62c   :  { %v1397_v6 = vpop.f32.mrf.mxu0  ;;  %v1438_v7 = vpop.f32.mrf.mxu1 }
 0x62d   :  { %v1445_v8 = vadd.f32 %v1397_v6, %v3488_v58  ;;  %v1447_v37 = vadd.f32 %v1438_v7, %v3491_v35  ;;  %v1477_v58 = vpop.permute.xlu1 %1476 }
 0x62e   :  { %v1399_v61 = vpop.f32.mrf.mxu0  ;;  %v1440_v62 = vpop.f32.mrf.mxu1  ;;  %vm1478_vm14 = vcmp.eq.s32.totalorder %v1477_v58, 1  ;;  %v2705_v58 = vmov 0.0  }
 0x62f   :  { %v2151_v60 = vmul.f32 -1.442695, %v1445_v8  ;;  %v1446_v32 = vadd.f32 %v1399_v61, %v3489_v24  ;;  %v1448_v36 = vadd.f32 %v1440_v62, %v3490_v34 }
 0x630   :  { %v1401_v27 = vpop.f32.mrf.mxu0  ;;  %v1442_v12 = vpop.f32.mrf.mxu1 }
 0x631   :  { %2465 = vpow2.f32 %v2151_v60  ;;  %v2152_v13 = vmul.f32 -1.442695, %v1446_v32  ;;  %v2153_v11 = vmul.f32 -1.442695, %v1448_v36 }
 0x632   :  { %v1402_v33 = vpop.f32.mrf.mxu0  ;;  %v1443_v25 = vpop.f32.mrf.mxu1 }
 0x633   :  { %2467 = vpow2.f32 %v2152_v13 }
 0x634   :  { %2469 = vtanh.f32 %v1447_v37 }
 0x635   :  { %2471 = vpow2.f32 %v2153_v11 }
 0x63e   :  { %v2466_v29 = vpop.eup %2465 }
 0x63f   :  { %v1452_v16 = vadd.f32 1.0, %v2466_v29  ;;  %v2367_v29 = vld [vmem:[#allocation10 + $0x30] sm:$0xff]  }
 0x640   :  { %v2468_v10 = vpop.eup %2467 }
 0x641   :  { %2473 = vrcp.f32 %v1452_v16  ;;  %v1458_v14 = vadd.f32 1.0, %v2468_v10  ;;  %v2470_v22 = vpop.eup %2469  ;;  %v2366_v16 = vld [vmem:[#allocation3] sm:$0xff]   ;;  %v2368_v10 = vld [vmem:[#allocation10 + $0x28] sm:$0xff]  }
 0x642   :  { %v2472_v19 = vpop.eup %2471 }
 0x643   :  { %2475 = vrcp.f32 %v1458_v14  ;;  %v1465_v52 = vadd.f32 1.0, %v2472_v19  ;;  %v2369_v14 = vld [vmem:[#allocation10 + $0x20] sm:$0xff]   ;;  %v2371_v19 = vld [vmem:[#allocation10 + $0x10] sm:$0xff]  }
 0x645   :  { %2477 = vrcp.f32 %v1465_v52 }
 0x64e   :  { %v2474_v50 = vpop.eup %2473 }
 0x64f   :  { %v1469_v51 = vmul.f32 %v2474_v50, %v2470_v22  ;;  %v2370_v22 = vld [vmem:[#allocation10 + $0x18] sm:$0xff]   ;;  %v2372_v50 = vld [vmem:[#allocation10 + $0x8] sm:$0xff]  }
 0x650   :  { %v2476_v1 = vpop.eup %2475 }
 0x651   :  { %v1468_v6 = vmul.f32 %v2476_v1, %v3301_v30  ;;  %v2374_v1 = vld [vmem:[#allocation3 + $0x8] sm:$0xff]  }
 0x652   :  { %v2478_v61 = vpop.eup %2477 }
 0x653   :  { %v1470_v8 = vadd.f32 %v1469_v51, %v1468_v6  ;;  %v2373_v51 = vld [vmem:[#allocation10] sm:$0xff]   ;;  %v2376_v6 = vld [vmem:[#allocation12 + $0x38] sm:$0xff]  }
 0x655   :  { %2479 = vtanh.f32 %v1470_v8  ;;  %v3364_v7 = vsel %vm1478_vm14, %v1470_v8, %v3301_v30  ;;  %v2377_v8 = vld [vmem:[#allocation12 + $0x30] sm:$0xff]  }
 0x662   :  { %v2480_v62 = vpop.eup %2479 }
 0x663   :  { %v1472_v60 = vmul.f32 %v2480_v62, %v2478_v61  ;;  %v2379_v61 = vld [vmem:[#allocation12 + $0x20] sm:$0xff]   ;;  %v2380_v62 = vld [vmem:[#allocation12 + $0x18] sm:$0xff]  }
 0x665   :  { %v3367_v24 = vsel %vm1478_vm14, %v1472_v60, %v3304_v63  ;;  %v1481_v32 = vsel %vm1478_vm14, %v1472_v60, 0.0  ;;  %v2381_v60 = vld [vmem:[#allocation12 + $0x10] sm:$0xff]  }
 0x666   :  { %v1482_v27 = vpack.c.bf16 %v1481_v32, %v1481_v32  ;;  %v1490_v12 = vpack.c.bf16 %v3367_v24, %v3367_v24  ;;  %v2383_v32 = vld [vmem:[#allocation12] sm:$0xff]  }
 0x668   :  { %1484 = vst [vmem:[#allocation3 + $0x14] sm:$0xf] %v1482_v27  ;;  %1524 = vmatmul.mubr.bf16.vlgmr.msra.gmra.mxu0 %v1490_v12  ;;  %1565 = vmatmul.mubr.bf16.vlgmr.msra.gmra.mxu1 %v1490_v12 }
 0x669   :  { %1620 = vmatpush1.bf16.msra.mxu0 %v3217_v15  ;;  %1661 = vmatpush1.bf16.msra.mxu1 %v3220_v0 }
 0x66a   :  { %1621 = vmatprep.subr.bf16.mxu0 %v3223_v18  ;;  %1662 = vmatprep.subr.bf16.mxu1 %v3226_v26  ;;  %v3492_v18 = vld [vmem:[#allocation35_spill] sm:$0xff] }
 0x66b   :  { %1651 = vmatprep.mubr.bf16.mxu0 %v3477_v31  ;;  %1692 = vmatprep.mubr.bf16.mxu1 %v3477_v31  ;;  %v2365_v31 = vld [vmem:[#allocation10 + $0x38] sm:$0xff]  }
 0x66d   :  { %1622 = vmatpush1.bf16.msra.mxu0 %v3231_v55  ;;  %1663 = vmatpush1.bf16.msra.mxu1 %v3234_v20 }
 0x66e   :  { %1623 = vmatprep.subr.bf16.mxu0 %v3237_v17  ;;  %1664 = vmatprep.subr.bf16.mxu1 %v3240_v23  ;;  %v3493_v23 = vld [vmem:[#allocation37_spill] sm:$0xff] }
 0x66f   :  { %v2375_v52 = vld [vmem:[#allocation3 + $0x10] sm:$0xff]  }
 0x671   :  { %1624 = vmatpush1.bf16.msra.mxu0 %v3243_v53  ;;  %1665 = vmatpush1.bf16.msra.mxu1 %v3246_v28 }
 0x672   :  { %1625 = vmatprep.subr.bf16.mxu0 %v3249_v21  ;;  %1666 = vmatprep.subr.bf16.mxu1 %v3252_v38 }
 0x675   :  { %1626 = vmatpush1.bf16.msra.mxu0 %v3255_v39  ;;  %1667 = vmatpush1.bf16.msra.mxu1 %v3258_v40 }
 0x676   :  { %1627 = vmatprep.subr.bf16.mxu0 %v3261_v41  ;;  %1668 = vmatprep.subr.bf16.mxu1 %v3264_v42  ;;  %v3494_v41 = vld [vmem:[#allocation38_spill] sm:$0xff] }
 0x679   :  { %1628 = vmatpush1.bf16.msra.mxu0 %v3267_v43  ;;  %1669 = vmatpush1.bf16.msra.mxu1 %v3270_v45  ;;  %v3495_v43 = vld [vmem:[#allocation36_spill] sm:$0xff] }
 0x67a   :  { %1629 = vmatprep.subr.bf16.mxu0 %v3273_v46  ;;  %1670 = vmatprep.subr.bf16.mxu1 %v3276_v47 }
 0x67d   :  { %1630 = vmatpush1.bf16.msra.mxu0 %v3279_v48  ;;  %1671 = vmatpush1.bf16.msra.mxu1 %v3282_v49 }
 0x67e   :  { %1631 = vmatprep.subr.bf16.mxu0 %v3332_v59  ;;  %1672 = vmatprep.subr.bf16.mxu1 %v3335_v44 }
 0x681   :  { %1632 = vmatpush1.bf16.msra.mxu0 %v3338_v3  ;;  %1673 = vmatpush1.bf16.msra.mxu1 %v3341_v54 }
 0x682   :  { %1633 = vmatprep.subr.bf16.mxu0 %v3344_v4  ;;  %1674 = vmatprep.subr.bf16.mxu1 %v3347_v56  ;;  %v1605_v56 = vpop.permute.xlu0 %1604 }
 0x683   :  { %vm1606_vm15 = vcmp.eq.s32.totalorder %v1605_v56, 1 }
 0x685   :  { %1634 = vmatpush1.bf16.msra.mxu0 %v3350_v5  ;;  %1675 = vmatpush1.bf16.msra.mxu1 %v3353_v57 }
 0x686   :  { %2203 = vmatprep.subr.bf16.mxu0 %v2365_v31  ;;  %2227 = vmatprep.subr.bf16.mxu1 %v2705_v58 }
 0x728   :  { %v1525_v15 = vpop.f32.mrf.mxu0  ;;  %v1566_v0 = vpop.f32.mrf.mxu1 }
 0x729   :  { %v1573_v26 = vadd.f32 %v1525_v15, %v3492_v18  ;;  %v1575_v45 = vadd.f32 %v1566_v0, %v3495_v43 }
 0x72a   :  { %v1527_v55 = vpop.f32.mrf.mxu0  ;;  %v1568_v20 = vpop.f32.mrf.mxu1 }
 0x72b   :  { %v2154_v17 = vmul.f32 -1.442695, %v1573_v26  ;;  %v1574_v53 = vadd.f32 %v1527_v55, %v3493_v23  ;;  %v1576_v42 = vadd.f32 %v1568_v20, %v3494_v41 }
 0x72c   :  { %v1529_v28 = vpop.f32.mrf.mxu0  ;;  %v1570_v21 = vpop.f32.mrf.mxu1 }
 0x72d   :  { %2481 = vpow2.f32 %v2154_v17  ;;  %v2155_v38 = vmul.f32 -1.442695, %v1574_v53  ;;  %v2156_v46 = vmul.f32 -1.442695, %v1576_v42 }
 0x72e   :  { %v1530_v39 = vpop.f32.mrf.mxu0  ;;  %v1571_v40 = vpop.f32.mrf.mxu1 }
 0x72f   :  { %2483 = vpow2.f32 %v2155_v38  ;;  %v3497_v38 = vld [vmem:[#allocation40_spill] sm:$0xff] }
 0x730   :  { %2485 = vtanh.f32 %v1575_v45 }
 0x731   :  { %2487 = vpow2.f32 %v2156_v46 }
 0x73a   :  { %v2482_v47 = vpop.eup %2481 }
 0x73b   :  { %v1580_v48 = vadd.f32 1.0, %v2482_v47 }
 0x73c   :  { %v2484_v49 = vpop.eup %2483 }
 0x73d   :  { %2489 = vrcp.f32 %v1580_v48  ;;  %v1586_v30 = vadd.f32 1.0, %v2484_v49  ;;  %v2486_v63 = vpop.eup %2485 }
 0x73e   :  { %v2488_v59 = vpop.eup %2487 }
 0x73f   :  { %2491 = vrcp.f32 %v1586_v30  ;;  %v1593_v4 = vadd.f32 1.0, %v2488_v59 }
 0x741   :  { %2493 = vrcp.f32 %v1593_v4 }
 0x74a   :  { %v2490_v44 = vpop.eup %2489 }
 0x74b   :  { %v1597_v3 = vmul.f32 %v2490_v44, %v2486_v63 }
 0x74c   :  { %v2492_v54 = vpop.eup %2491 }
 0x74d   :  { %v1596_v5 = vmul.f32 %v2492_v54, %v3364_v7 }
 0x74e   :  { %v2494_v33 = vpop.eup %2493 }
 0x74f   :  { %v1598_v57 = vadd.f32 %v1597_v3, %v1596_v5 }
 0x751   :  { %2495 = vtanh.f32 %v1598_v57  ;;  %v3409_v13 = vsel %vm1606_vm15, %v1598_v57, %v3364_v7  ;;  %v2378_v7 = vld [vmem:[#allocation12 + $0x28] sm:$0xff]  }
 0x75e   :  { %v2496_v25 = vpop.eup %2495 }
 0x75f   :  { %v1600_v34 = vmul.f32 %v2496_v25, %v2494_v33 }
 0x761   :  { %v3412_v36 = vsel %vm1606_vm15, %v1600_v34, %v3367_v24  ;;  %v1609_v35 = vsel %vm1606_vm15, %v1600_v34, 0.0  ;;  %v2382_v24 = vld [vmem:[#allocation12 + $0x8] sm:$0xff]   ;;  %v1733_v34 = vpop.permute.xlu1 %1732 }
 0x762   :  { %v1610_v37 = vpack.c.bf16 %v1609_v35, %v1609_v35  ;;  %v1618_v11 = vpack.c.bf16 %v3412_v36, %v3412_v36  ;;  %vm1734_vm1 = vcmp.eq.s32.totalorder %v1733_v34, 1 }
 0x764   :  { %1612 = vst [vmem:[#allocation3 + $0x18] sm:$0xf] %v1610_v37  ;;  %1652 = vmatmul.mubr.bf16.vlgmr.msra.gmra.mxu0 %v1618_v11  ;;  %1693 = vmatmul.mubr.bf16.vlgmr.msra.gmra.mxu1 %v1618_v11 }
 0x765   :  { %2204 = vmatpush3.bf16.msra.mxu0 %v2365_v31  ;;  %2219 = vmatprep.mubr.bf16.mxu0 %v2366_v16  ;;  %v3496_v31 = vld [vmem:[#allocation39_spill] sm:$0xff] }
 0x766   :  { %2205 = vmatprep.subr.bf16.mxu0 %v2367_v29  ;;  %2228 = vmatpush3.bf16.msra.mxu1 %v2376_v6 }
 0x767   :  { %2229 = vmatprep.subr.bf16.mxu1 %v2705_v58  ;;  %2243 = vmatprep.mubr.msk.bf16.mxu1 %vm2706_vm0, %v2705_v58 }
 0x769   :  { %2206 = vmatpush3.bf16.msra.mxu0 %v2367_v29 }
 0x76a   :  { %2207 = vmatprep.subr.bf16.mxu0 %v2368_v10  ;;  %2230 = vmatpush3.bf16.msra.mxu1 %v2377_v8 }
 0x76b   :  { %2231 = vmatprep.subr.bf16.mxu1 %v2705_v58 }
 0x76d   :  { %2208 = vmatpush3.bf16.msra.mxu0 %v2368_v10 }
 0x76e   :  { %2209 = vmatprep.subr.bf16.mxu0 %v2369_v14  ;;  %2232 = vmatpush3.bf16.msra.mxu1 %v2378_v7 }
 0x76f   :  { %2233 = vmatprep.subr.bf16.mxu1 %v2705_v58 }
 0x771   :  { %2210 = vmatpush3.bf16.msra.mxu0 %v2369_v14  ;;  %v2173_v14 = vld [vmem:[%s3452_s8] ss:$0 sm:$0xff] }
 0x772   :  { %2211 = vmatprep.subr.bf16.mxu0 %v2370_v22  ;;  %2234 = vmatpush3.bf16.msra.mxu1 %v2379_v61 }
 0x773   :  { %2235 = vmatprep.subr.bf16.mxu1 %v2705_v58 }
 0x775   :  { %2212 = vmatpush3.bf16.msra.mxu0 %v2370_v22 }
 0x776   :  { %2213 = vmatprep.subr.bf16.mxu0 %v2371_v19  ;;  %2236 = vmatpush3.bf16.msra.mxu1 %v2380_v62 }
 0x777   :  { %2237 = vmatprep.subr.bf16.mxu1 %v2705_v58 }
 0x779   :  { %2214 = vmatpush3.bf16.msra.mxu0 %v2371_v19 }
 0x77a   :  { %2215 = vmatprep.subr.bf16.mxu0 %v2372_v50  ;;  %2238 = vmatpush3.bf16.msra.mxu1 %v2381_v60 }
 0x77b   :  { %2239 = vmatprep.subr.bf16.mxu1 %v2705_v58 }
 0x77d   :  { %2216 = vmatpush3.bf16.msra.mxu0 %v2372_v50 }
 0x77e   :  { %2217 = vmatprep.subr.bf16.mxu0 %v2373_v51  ;;  %2240 = vmatpush3.bf16.msra.mxu1 %v2382_v24 }
 0x77f   :  { %2241 = vmatprep.subr.bf16.mxu1 %v2705_v58 }
 0x781   :  { %2218 = vmatpush3.bf16.msra.mxu0 %v2373_v51 }
 0x782   :  { %2242 = vmatpush3.bf16.msra.mxu1 %v2383_v32 }
 0x784   :  { %2220 = vmatmul.mubr.bf16.vlgmr.msra.gmra.mxu0 %v2374_v1 }
 0x785   :  { %2223 = vmatprep.mubr.bf16.mxu0 %v2375_v52 }
 0x824   :  { %v1653_v27 = vpop.f32.mrf.mxu0  ;;  %v1694_v12 = vpop.f32.mrf.mxu1 }
 0x825   :  { %v1701_v15 = vadd.f32 %v1653_v27, %v3496_v31  ;;  %v1703_v39 = vadd.f32 %v1694_v12, %v3497_v38 }
 0x826   :  { %v1655_v0 = vpop.f32.mrf.mxu0  ;;  %v1696_v18 = vpop.f32.mrf.mxu1 }
 0x827   :  { %v2157_v26 = vmul.f32 -1.442695, %v1701_v15  ;;  %v1702_v55 = vadd.f32 %v1655_v0, %v3038_v2  ;;  %v1704_v21 = vadd.f32 %v1696_v18, %v3041_v9  ;;  %v3423_v2 = vld [vmem:[%s3450_s6] ss:$0 sm:$0xff] }
 0x828   :  { %v1657_v20 = vpop.f32.mrf.mxu0  ;;  %v1698_v17 = vpop.f32.mrf.mxu1 }
 0x829   :  { %2497 = vpow2.f32 %v2157_v26  ;;  %v2158_v23 = vmul.f32 -1.442695, %v1702_v55  ;;  %v2159_v40 = vmul.f32 -1.442695, %v1704_v21 }
 0x82a   :  { %v1658_v53 = vpop.f32.mrf.mxu0  ;;  %v1699_v28 = vpop.f32.mrf.mxu1 }
 0x82b   :  { %2499 = vpow2.f32 %v2158_v23 }
 0x82c   :  { %2501 = vtanh.f32 %v1703_v39 }
 0x82d   :  { %2503 = vpow2.f32 %v2159_v40 }
 0x836   :  { %v2498_v41 = vpop.eup %2497 }
 0x837   :  { %v1708_v42 = vadd.f32 1.0, %v2498_v41 }
 0x838   :  { %v2500_v43 = vpop.eup %2499 }
 0x839   :  { %2505 = vrcp.f32 %v1708_v42  ;;  %v1714_v45 = vadd.f32 1.0, %v2500_v43  ;;  %v2502_v46 = vpop.eup %2501 }
 0x83a   :  { %v2504_v48 = vpop.eup %2503 }
 0x83b   :  { %2507 = vrcp.f32 %v1714_v45  ;;  %v1721_v3 = vadd.f32 1.0, %v2504_v48 }
 0x83d   :  { %2509 = vrcp.f32 %v1721_v3 }
 0x844   :  { %v2221_v47 = vpop.f32.mrf.mxu0 }
 0x845   :  { %v1886_v9 = vadd.f32 %v2221_v47, %v3423_v2 }
 0x846   :  { %v2506_v49 = vpop.eup %2505  ;;  %v1877_v30 = vpop.f32.mrf.mxu0 }
 0x847   :  { %v1725_v63 = vmul.f32 %v2506_v49, %v2502_v46  ;;  %1910 = vst [vmem:[#allocation13 + $0x10] sm:$0xff] %v1886_v9  ;;  %v1878_v59 = vadd.f32 %v3423_v2, %v1877_v30 }
 0x848   :  { %v2508_v44 = vpop.eup %2507  ;;  %v2222_v54 = vpop.f32.mrf.mxu0 }
 0x849   :  { %v1724_v4 = vmul.f32 %v2508_v44, %v3409_v13  ;;  %1908 = vst [vmem:[#allocation13] sm:$0xff] %v1878_v59  ;;  %v1889_v56 = vadd.f32 %v2222_v54, %v3423_v2 }
 0x84a   :  { %v1880_v5 = vpop.f32.mrf.mxu0  ;;  %v2510_v25 = vpop.eup %2509 }
 0x84b   :  { %v1726_v57 = vadd.f32 %v1725_v63, %v1724_v4  ;;  %1911 = vst [vmem:[#allocation13 + $0x18] sm:$0xff] %v1889_v56  ;;  %v1881_v33 = vadd.f32 %v3423_v2, %v1880_v5 }
 0x84d   :  { %2511 = vtanh.f32 %v1726_v57  ;;  %1909 = vst [vmem:[#allocation13 + $0x8] sm:$0xff] %v1881_v33 }
 0x85a   :  { %v2512_v35 = vpop.eup %2511 }
 0x85b   :  { %v1728_v37 = vmul.f32 %v2512_v35, %v2510_v25 }
 0x85d   :  { %v1735_v11 = vsel %vm1734_vm1, %v1728_v37, %v3412_v36  ;;  %v1736_v29 = vsel %vm1734_vm1, %v1728_v37, 0.0 }
 0x85e   :  { %v1737_v13 = vpack.c.bf16 %v1736_v29, %v1736_v29  ;;  %v1933_v16 = vpack.c.bf16 %v1735_v11, %v1735_v11 }
 0x860   :  { %1739 = vst [vmem:[#allocation3 + $0x1c] sm:$0xf] %v1737_v13  ;;  %2244 = vmatmul.mubr.bf16.vlgmr.msra.gmra.mxu1 %v1933_v16 }
 0x867   :  { %v2384_v10 = vld [vmem:[#allocation3 + $0x18] sm:$0xff]  }
 0x868   :  { %2224 = vmatmul.mubr.bf16.gmra.mxu0 %v2384_v10 }
 0x920   :  { %v2022_v22 = vpop.f32.mrf.mxu1 }
 0x921   :  { %v2023_v19 = vadd.f32 %v2173_v14, %v2022_v22 }
 0x922   :  { %v2245_v50 = vpop.f32.mrf.mxu1 }
 0x923   :  { %2028 = vst [vmem:[#allocation14] sm:$0xff] %v2023_v19 }
 0x924   :  { %v2025_v51 = vpop.f32.mrf.mxu1 }
 0x925   :  { %2656 = shalt.err (!%p2653_p1)
}
 0x926   :  { %2050 = dma.vmem_to_hbm [thread:$0]  %s2048_s23, 128, %s3454_s10, [#allocation15]   ;;  %v2246_v36 = vpop.f32.mrf.mxu1 }
 0x927   :  { %s2708_s8 = smov [#allocation13]  }
 0x928   :  { %v2225_v1 = vpop.f32.mrf.mxu0  ;;  %s2034_s27 = sshll.u32 %s2708_s8, 4  ;;  %s2035_s27 = int_to_ptr.vmem [resolvable:$true] %s2034_s27 }
 0x929   :  { %v1902_v52 = vadd.f32 %v2225_v1, %v3423_v2  ;;  %s2665_s10 = scalar_lea.vmem %s2035_s27, 1024  ;;  %p2670_p3 = scmp.lt.s32.totalorder %s2035_s27, %s2035_s27 }
 0x92a   :  { %v1893_v6 = vpop.f32.mrf.mxu0  ;;  %p2666_p2 = scmp.ne.s32.totalorder %s2035_s27, %s2665_s10  ;;  %p2671_p4 = scmp.lt.s32.totalorder %s2665_s10, %s2665_s10 }
 0x92b   :  { %1914 = vst [vmem:[#allocation13 + $0x30] sm:$0xff] %v1902_v52  ;;  %v1894_v58 = vadd.f32 %v3423_v2, %v1893_v6 }
 0x92c   :  { %v2226_v8 = vpop.f32.mrf.mxu0  ;;  %p2672_p5 = por %p2671_p4, %p2670_p3 }
 0x92d   :  { %1912 = vst [vmem:[#allocation13 + $0x20] sm:$0xff] %v1894_v58  ;;  %v1905_v7 = vadd.f32 %v2226_v8, %v3423_v2 }
 0x92e   :  { %v1896_v61 = vpop.f32.mrf.mxu0  ;;  %p2673_p6 = pnand %p2672_p5, %p2666_p2 }
 0x92f   :  { %1915 = vst [vmem:[#allocation13 + $0x38] sm:$0xff] %v1905_v7  ;;  %v1897_v62 = vadd.f32 %v3423_v2, %v1896_v61 }
 0x931   :  { %1913 = vst [vmem:[#allocation13 + $0x28] sm:$0xff] %v1897_v62 }
 0x932   :  { %2676 = shalt.err (!%p2673_p6)
}
 0x933   :  { %s2709_s28 = smov 128   ;;  %s2710_s2 = smov 8  }
 0x934   :  { %2040 = dma.vmem_to_hbm [thread:$0]  %s2035_s27, 1024, %s3453_s9, [#allocation6], %s2709_s28, %s2709_s28, %s2710_s2  }
 0x935   :  { %2691 = dma.done.wait [#allocation6], 1024  }
 0x936   :  { %2692 = vsyncadd [#allocation6], 4294966272 }
 0x937   :  { %2693 = dma.done.wait [#allocation15], 128  }
 0x938   :  { %2694 = vsyncadd [#allocation15], 4294967168 }
 0x939   :  { %2057 = vsyncpa [#allocation5], 1 }
 0x93a   :  { %2058 = vsyncpa [#allocation8], 1 }
 0x93b   :  { %2059 = vsyncpa [#allocation11], 1 }
 0x93c   :  { %2060 = vsyncpa [#allocation6], 1 }
 0x93d   :  { %2061 = vsyncpa [#allocation15], 1 }

</bundles_post_ra>
